<compile_context>
chip_gen: v7x
topology: tpu7x:2x2x1
jax: 0.10.0
libtpu: 0.0.40
codegen_flags: <defaults>
</compile_context>

<pallas_src>
import functools

import numpy as np

import jax
import jax.numpy as jnp
from jax import lax
from jax.experimental import pallas as pl
from jax.experimental.pallas import tpu as pltpu


# ----------------------------- small helpers --------------------------------

def _softplus(y):
    # matches F.softplus (beta=1, threshold=20)
    return jnp.where(y > 20.0, y, jnp.log1p(jnp.exp(jnp.minimum(y, 20.0))))


def _vmem_capacity_bytes():
    try:
        cap = getattr(pltpu.get_tpu_info(), "vmem_capacity_bytes", None)
        if cap:
            return int(cap)
    except Exception:
        pass
    return 128 * 1024 * 1024        # v5e/v6e; v7x has 64 MiB (get_tpu_info reports it)


def _vmem_limit(need_bytes, cap_bytes):
    return int(min(max(need_bytes + (2 << 20), 32 << 20), int(0.92 * cap_bytes)))


def _lambda_vmem_need(tn, um, heads, dim_k, dim_v):
    # double-buffered pipeline inputs + in-kernel live values, rough upper bound
    e_blk = um * dim_k * tn * 2                         # bf16 E tile
    vf_blk = dim_v * um * 2                             # bf16 values
    q_blk = heads * dim_k * tn * 4
    a_blk = heads * dim_v * tn * 4
    lamct_blk = dim_v * dim_k * 4
    work = (dim_v * dim_k * tn + 2 * dim_v * tn) * 4    # lam + acc + d_k
    return 2 * (e_blk + vf_blk + q_blk + a_blk + lamct_blk) + work + (2 << 20)


def _pick_lambda_tile(n, m, heads, dim_k, dim_u, dim_v, vmem_cap):
    # largest 128-aligned n-tile whose working set fits comfortably in this chip's VMEM
    cands = [t for t in (512, 256, 128) if n > t and n % t == 0] or [n]
    for tn in cands:
        if _lambda_vmem_need(tn, dim_u * m, heads, dim_k, dim_v) <= 0.8 * vmem_cap:
            return tn
    # TODO(synk): for very large n that is not a multiple of 128 this falls back to the
    # smallest candidate, which may still not fit small-VMEM generations.
    return cands[-1]


def _pick_hw_tile(hw):
    for t in (512, 256):
        if hw > t and hw % t == 0:
            return t
    return hw


# ----------------------------- kernels ---------------------------------------

def preproc_kernel(x_ref, w_ref, b_ref, o_ref):
    # x: (1, 3, T, HW) f32, w: (C, 3) SMEM, b: (C,) SMEM -> o: (1, C, T, HW) bf16
    # Conv3d(3->C, k=1) as VPU FMAs; bf16 out (feeds only the MXU downstream).
    x0 = x_ref[0, 0]
    x1 = x_ref[0, 1]
    x2 = x_ref[0, 2]
    n_out = o_ref.shape[1]

    def body(c, carry):
        y = w_ref[c, 0] * x0 + w_ref[c, 1] * x1 + w_ref[c, 2] * x2 + b_ref[c]
        o_ref[0, c] = _softplus(y).astype(o_ref.dtype)
        return carry

    lax.fori_loop(0, n_out, body, 0, unroll=min(8, n_out))


def qkv_proj_kernel(x_ref, w_ref, o_ref):
    # x: (1, dim, thw) bf16, w: (oq+ok+ov, dim) bf16 -> o: (1, oq+ok+ov, thw) f32
    o_ref[0] = jnp.dot(w_ref[...], x_ref[0], preferred_element_type=jnp.float32)


def lambda_core_kernel(q_ref, vf_ref, lamct_ref, e_ref, a_ref, o_ref, *, dim_k):
    # per (n-tile j, batch b) block:
    #   q    : (1, heads, K, tn) f32      vf : (1, V, U*m)        bf16
    #   lamct: (1, V, K)         f32      e  : (1, U*m, K*tn)     bf16
    #   a    : (heads, V, tn)    f32   (precomputed target-conv+avg-pool functional)
    # output: (1, 1, 8, 128) f32  -- scalar contribution sum_{h,v,n} A*Y, tile-broadcast.
    heads = q_ref.shape[1]
    tn = q_ref.shape[-1]
    dim_v = vf_ref.shape[1]

    # position lambdas for this n-tile: ONE lane-dense MXU matmul
    #   lam[v, k*tn + t] = sum_um vf[v, um] * E[um, k*tn + t]
    lam = jnp.dot(vf_ref[0], e_ref[0], preferred_element_type=jnp.float32)   # (V, K*tn)

    q = q_ref[0]                 # (heads, K, tn)
    lamct = lamct_ref[0]         # (V, K)  content lambda (hoisted, n-tile invariant)
    a = a_ref[...]               # (heads, V, tn)

    acc = jnp.zeros((dim_v, tn), jnp.float32)
    for kk in range(dim_k):
        # d_k[v, t] = sum_h A[h, v, t] * q[h, kk, t]
        d_k = a[0] * q[0, kk][None, :]
        for h in range(1, heads):
            d_k = d_k + a[h] * q[h, kk][None, :]
        lam_k = lam[:, kk * tn:(kk + 1) * tn] + lamct[:, kk:kk + 1]
        acc = acc + lam_k * d_k

    tot = jnp.sum(acc, axis=0, keepdims=True).sum(axis=1, keepdims=True)     # (1, 1)
    # full (8,128) tile store: unmasked, and no sub-tile write sharing between grid steps
    o_ref[0, 0] = jnp.broadcast_to(tot, o_ref.shape[2:])


# --------------------------- pallas wrappers ---------------------------------

def preproc_call(x4, w, b):
    B, _, T, HW = x4.shape
    C = w.shape[0]
    return pl.pallas_call(
        preproc_kernel,
        out_shape=jax.ShapeDtypeStruct((B, C, T, HW), jnp.bfloat16),
        grid=(B,),
        in_specs=[pl.BlockSpec((1, 3, T, HW), lambda b_: (b_, 0, 0, 0)),
                  pl.BlockSpec(memory_space=pltpu.MemorySpace.SMEM),
                  pl.BlockSpec(memory_space=pltpu.MemorySpace.SMEM)],
        out_specs=pl.BlockSpec((1, C, T, HW), lambda b_: (b_, 0, 0, 0)),
        compiler_params=pltpu.CompilerParams(dimension_semantics=("parallel",)),
    )(x4, w, b)


def qkv_proj_call(xbn_bf16, w_qkv_bf16):
    B, dim, HW = xbn_bf16.shape
    oc = w_qkv_bf16.shape[0]
    thw = _pick_hw_tile(HW)
    n_hw = HW // thw
    cap = _vmem_capacity_bytes()
    need = 2 * (oc * dim * 2 + dim * thw * 2 + oc * thw * 4)
    return pl.pallas_call(
        qkv_proj_kernel,
        out_shape=jax.ShapeDtypeStruct((B, oc, HW), jnp.float32),
        grid=(B, n_hw),
        in_specs=[pl.BlockSpec((1, dim, thw), lambda b_, h_: (b_, 0, h_)),
                  pl.BlockSpec((oc, dim), lambda b_, h_: (0, 0))],
        out_specs=pl.BlockSpec((1, oc, thw), lambda b_, h_: (b_, 0, h_)),
        compiler_params=pltpu.CompilerParams(
            dimension_semantics=("parallel", "arbitrary"),
            vmem_limit_bytes=_vmem_limit(need, cap)),
    )(xbn_bf16, w_qkv_bf16)


def lambda_call(q, vf, lamct, e_lam, a_exc):
    B, heads, dim_k, n = q.shape
    dim_v, um = vf.shape[1], vf.shape[2]
    n_tiles = e_lam.shape[0]
    tn = n // n_tiles
    assert e_lam.shape == (n_tiles, um, dim_k * tn)
    assert a_exc.shape == (heads, dim_v, n)

    cap = _vmem_capacity_bytes()
    need = _lambda_vmem_need(tn, um, heads, dim_k, dim_v)
    kern = functools.partial(lambda_core_kernel, dim_k=dim_k)
    return pl.pallas_call(
        kern,
        out_shape=jax.ShapeDtypeStruct((n_tiles, B, 8, 128), jnp.float32),
        # batch innermost: the E tile index (j) is constant across consecutive steps,
        # so the big E block is fetched once per n-tile instead of once per step.
        grid=(n_tiles, B),
        in_specs=[
            pl.BlockSpec((1, heads, dim_k, tn), lambda j, b: (b, 0, 0, j)),
            pl.BlockSpec((1, dim_v, um), lambda j, b: (b, 0, 0)),
            pl.BlockSpec((1, dim_v, dim_k), lambda j, b: (b, 0, 0)),
            pl.BlockSpec((1, um, dim_k * tn), lambda j, b: (j, 0, 0)),
            pl.BlockSpec((heads, dim_v, tn), lambda j, b: (0, 0, j)),
        ],
        out_specs=pl.BlockSpec((1, 1, 8, 128), lambda j, b: (j, b, 0, 0)),
        compiler_params=pltpu.CompilerParams(
            dimension_semantics=("parallel", "arbitrary"),
            vmem_limit_bytes=_vmem_limit(need, cap)),
    )(q, vf, lamct, e_lam, a_exc)


# ------------------- hoisted (input-independent) precompute ------------------

def build_lambda_pos_emb(rel_pos_emb, H, W, dim_k, dim_u, tn, dtype=jnp.bfloat16):
    # e[j, u*m+mm, k*tn+t] = E[n=j*tn+t, mm, k, u] : ready for (V,U*m)@(U*m,K*tn) per tile.
    n = H * W
    m = n
    n_tiles = n // tn
    ii, jj = jnp.meshgrid(jnp.arange(H), jnp.arange(W), indexing='ij')
    pos = jnp.stack([ii.reshape(-1), jj.reshape(-1)], axis=-1)            # (n, 2)
    rel = pos[None, :, :] - pos[:, None, :]                               # (n, m, 2)
    E = rel_pos_emb[rel[..., 0] + (H - 1), rel[..., 1] + (W - 1)]         # (n, m, K, U)
    e = jnp.transpose(E, (3, 1, 2, 0)).reshape(dim_u * m, dim_k, n)       # (U*m, K, n)
    e = e.reshape(dim_u * m, dim_k, n_tiles, tn)
    e = jnp.transpose(e, (2, 0, 1, 3)).reshape(n_tiles, dim_u * m, dim_k * tn)
    return e.astype(dtype)


def build_target_functional(w_conv, H, W):
    # mean over space of Conv2d(Cin->1, 5x5, pad=2) is linear in the input:
    #   mean_ij conv(x)[i,j] = sum_{c,p,q} A[c,p,q] * x[c,p,q]   (+ bias, added in glue)
    p = jnp.arange(H)[:, None]
    dy = jnp.arange(5)[None, :]
    row_ok = ((p - dy + 2 >= 0) & (p - dy + 2 <= H - 1)).astype(jnp.float32)   # (H, 5)
    q = jnp.arange(W)[:, None]
    dx = jnp.arange(5)[None, :]
    col_ok = ((q - dx + 2 >= 0) & (q - dx + 2 <= W - 1)).astype(jnp.float32)   # (W, 5)
    A = jnp.einsum('cyx,py,qx->cpq', w_conv[0], row_ok, col_ok) / float(H * W)
    return A                                                                   # (Cin, H, W)


def prepare_params(raw, rel_pos_emb, *, H, W, heads, dim_k, dim_u, dim_v):
    """One-time parameter preprocessing (hoisted out of the jitted forward)."""
    n = H * W
    m = n
    dim = heads * dim_v
    cap = _vmem_capacity_bytes()
    tn = _pick_lambda_tile(n, m, heads, dim_k, dim_u, dim_v, cap)

    # permute wv rows (+ bnv affine) so v leaves the fused qkv matmul already in
    # (V, U) channel order -> vf layout is a free reshape (no HBM transpose).
    perm = jnp.arange(dim_u * dim_v).reshape(dim_u, dim_v).T.reshape(-1)
    w_qkv = jnp.concatenate([raw['wq'], raw['wk'], raw['wv'][perm]], axis=0)

    p = dict(raw)
    p['w_qkv'] = w_qkv.astype(jnp.bfloat16)
    p['bnv_g_perm'] = raw['bnv_g'][perm]
    p['bnv_b_perm'] = raw['bnv_b'][perm]
    p['e_lam'] = build_lambda_pos_emb(rel_pos_emb, H, W, dim_k, dim_u, tn)
    a_all = build_target_functional(raw['tconv_w'], H, W)                # (Cin, H, W)
    p['a_exc'] = a_all[:dim].reshape(heads, dim_v, n)
    p['a_frame'] = a_all[dim].reshape(n)
    for key in ('wq', 'wk', 'wv', 'bnv_g', 'bnv_b', 'tconv_w'):
        del p[key]
    return p


# ----------------------------- forward pass ----------------------------------

def _bn2d_train(z, gamma, beta, eps=1e-5):
    # BatchNorm2d, train-mode batch statistics, channels-first (B, C, n) layout.
    mu = jnp.mean(z, axis=(0, 2), keepdims=True)
    var = jnp.mean(jnp.square(z - mu), axis=(0, 2), keepdims=True)
    return (z - mu) * lax.rsqrt(var + eps) * gamma[None, :, None] + beta[None, :, None]


def lambda_model_forward(x, params, *, dimensions, timesteps, heads=4, dim_k=8, dim_u=4):
    B, _, T, H, W = x.shape
    assert T == timesteps
    C = dimensions
    dim = C * T
    dim_v = dim // heads
    n = H * W
    m = n

    # --- preproc: Conv3d(3 -> C, k=1) + softplus, channels-first bf16 output ---
    x4 = x.reshape(B, 3, T, n)
    xbn4 = preproc_call(x4, params['preproc_w'], params['preproc_b'])    # (B, C, T, n) bf16
    xbn = xbn4.reshape(B, dim, n)                                        # .view(B, -1, H, W)

    # --- fused q/k/v 1x1 convs (bias-free), HW-tiled matmul ---
    qkv = qkv_proj_call(xbn, params['w_qkv'])                            # (B, 96.., n) f32
    oq, ok = heads * dim_k, dim_u * dim_k
    q_raw = qkv[:, :oq]
    k_raw = qkv[:, oq:oq + ok]
    v_raw = qkv[:, oq + ok:]                                             # (V,U) channel order

    q_n = _bn2d_train(q_raw, params['bnq_g'], params['bnq_b'])
    v_n = _bn2d_train(v_raw, params['bnv_g_perm'], params['bnv_b_perm'])

    q = q_n.reshape(B, heads, dim_k, n)                                  # (B, h, K, n)
    ks = jax.nn.softmax(k_raw.reshape(B, dim_u, dim_k, m), axis=-1)      # n-tile invariant
    v4 = v_n.reshape(B, dim_v, dim_u, m)                                 # free reshape
    lamct = jnp.einsum('bvum,bukm->bvk', v4, ks,
                       precision=lax.Precision.HIGHEST)                  # content lambda
    vf = v4.reshape(B, dim_v, dim_u * m).astype(jnp.bfloat16)            # MXU operand

    # --- lambda layer + fused target-conv/avg-pool contraction epilogue ---
    partial = lambda_call(q, vf, lamct, params['e_lam'], params['a_exc'])
    conv_sum = partial[:, :, 0, 0].sum(axis=0).reshape(B, 1)             # sum over n tiles

    frame = x[:, 2, 0].reshape(B, n)
    frame_term = jnp.einsum('bn,n->b', frame, params['a_frame'],
                            precision=lax.Precision.HIGHEST)[:, None]
    conv_mean = conv_sum + frame_term + params['tconv_b'].reshape(1, 1)

    # --- readout_dense: Linear(1, 1) ---
    out = conv_mean @ params['read_w'].T + params['read_b']              # (B, 1)
    jv_penalty = jnp.ones((1,), jnp.float32)                             # torch.tensor([1]).float()
    # TODO(synk): `testmode=True` branch references undefined `states`/`gates` in the
    # original module (dead code); only the (output, jv_penalty) path is implemented.
    return out, jv_penalty


# ------------------------- pure-JAX f32 reference ----------------------------

def reference_forward(x, raw, rel_pos_emb, *, dimensions, heads, dim_k, dim_u):
    B, _, T, H, W = x.shape
    dim = dimensions * T
    dim_v = dim // heads
    n = H * W
    m = n
    xbn = jnp.einsum('bcthw,oc->bothw', x, raw['preproc_w']) \
        + raw['preproc_b'][None, :, None, None, None]
    xbn = jax.nn.softplus(xbn).reshape(B, dim, H, W)

    def conv1x1(z, w):
        return jnp.einsum('bchw,oc->bohw', z, w)

    def bn(z, g, b_, eps=1e-5):
        mu = z.mean(axis=(0, 2, 3), keepdims=True)
        var = ((z - mu) ** 2).mean(axis=(0, 2, 3), keepdims=True)
        return (z - mu) / jnp.sqrt(var + eps) * g[None, :, None, None] + b_[None, :, None, None]

    q = bn(conv1x1(xbn, raw['wq']), raw['bnq_g'], raw['bnq_b']).reshape(B, heads, dim_k, n)
    k = conv1x1(xbn, raw['wk']).reshape(B, dim_u, dim_k, m)
    v = bn(conv1x1(xbn, raw['wv']), raw['bnv_g'], raw['bnv_b']).reshape(B, dim_u, dim_v, m)
    k = jax.nn.softmax(k, axis=-1)

    lam_c = jnp.einsum('bukm,buvm->bkv', k, v)
    y_c = jnp.einsum('bhkn,bkv->bhvn', q, lam_c)

    ii, jj = jnp.meshgrid(jnp.arange(H), jnp.arange(W), indexing='ij')
    pos = jnp.stack([ii.reshape(-1), jj.reshape(-1)], axis=-1)
    rel = pos[None, :, :] - pos[:, None, :]
    E = rel_pos_emb[rel[..., 0] + (H - 1), rel[..., 1] + (W - 1)]          # (n, m, K, U)
    lam_p = jnp.einsum('nmku,buvm->bnkv', E, v)
    y_p = jnp.einsum('bhkn,bnkv->bhvn', q, lam_p)

    Y = (y_c + y_p).reshape(B, dim, H, W)
    cat = jnp.concatenate([Y, x[:, 2, 0][:, None]], axis=1)
    conv = lax.conv_general_dilated(cat, raw['tconv_w'], (1, 1), ((2, 2), (2, 2)),
                                    dimension_numbers=('NCHW', 'OIHW', 'NCHW'))
    conv = conv + raw['tconv_b'][None, :, None, None]
    pooled = conv.mean(axis=(2, 3)).reshape(B, 1)
    return pooled @ raw['read_w'].T + raw['read_b']


# ------------------------------- main -----------------------------------------

if __name__ == "__main__":
    B, Cdim, T, H, W = 2, 4, 8, 8, 8          # dimensions=4, timesteps=8, 8x8 spatial
    heads, dim_k, dim_u = 4, 8, 4
    dim = Cdim * T
    dim_v = dim // heads
    Cin = heads * dim_v + 1
    n = H * W

    key = jax.random.PRNGKey(0)
    ks_ = jax.random.split(key, 10)
    x = jax.random.normal(ks_[0], (B, 3, T, H, W), jnp.float32)

    raw_params = {
        'preproc_w': 1.0 * jax.random.normal(ks_[1], (Cdim, 3), jnp.float32),
        'preproc_b': 0.5 * jax.random.normal(ks_[2], (Cdim,), jnp.float32),
        'wq': 0.1 * jax.random.normal(ks_[3], (heads * dim_k, dim), jnp.float32),
        'wk': 0.1 * jax.random.normal(ks_[4], (dim_u * dim_k, dim), jnp.float32),
        'wv': 0.1 * jax.random.normal(ks_[5], (dim_u * dim_v, dim), jnp.float32),
        'bnq_g': jnp.ones((heads * dim_k,), jnp.float32),
        'bnq_b': jnp.zeros((heads * dim_k,), jnp.float32),
        'bnv_g': jnp.ones((dim_u * dim_v,), jnp.float32),
        'bnv_b': jnp.zeros((dim_u * dim_v,), jnp.float32),
        'tconv_w': 0.1 * jax.random.normal(ks_[7], (1, Cin, 5, 5), jnp.float32),
        'tconv_b': jnp.zeros((1,), jnp.float32),          # torch.nn.init.zeros_
        'read_w': 0.1 * jax.random.normal(ks_[8], (1, 1), jnp.float32),
        'read_b': 0.1 * jax.random.normal(ks_[9], (1,), jnp.float32),
    }
    rel_pos_emb = jax.random.normal(ks_[6], (2 * H - 1, 2 * W - 1, dim_k, dim_u), jnp.float32)

    # one-time parameter preprocessing (weight concat/cast/permute, E relayout, A functional)
    params = prepare_params(raw_params, rel_pos_emb, H=H, W=W, heads=heads,
                            dim_k=dim_k, dim_u=dim_u, dim_v=dim_v)

    fwd = jax.jit(functools.partial(lambda_model_forward, dimensions=Cdim, timesteps=T,
                                    heads=heads, dim_k=dim_k, dim_u=dim_u))
    out, jv = fwd(x, params)
    jax.block_until_ready((out, jv))
    assert out.shape == (B, 1) and jv.shape == (1,)

    # numerical sanity check against a pure-JAX f32 reference of the PyTorch forward
    with jax.default_matmul_precision("highest"):
        out_ref = reference_forward(x, raw_params, rel_pos_emb, dimensions=Cdim,
                                    heads=heads, dim_k=dim_k, dim_u=dim_u)
    np.testing.assert_allclose(np.asarray(out), np.asarray(out_ref), rtol=0.15, atol=0.15)

    print("KERNEL_OK")
</pallas_src>

<mosaic_0001>
module attributes {stable_mosaic.version = 11 : i64} {
  func.func @preproc_kernel(%arg0: i32, %arg1: memref<1x3x8x64xf32, #tpu.memory_space<vmem>>, %arg2: memref<4x3xf32, #tpu.memory_space<smem>>, %arg3: memref<4xf32, #tpu.memory_space<smem>>, %arg4: memref<1x4x8x64xbf16, #tpu.memory_space<vmem>>) attributes {dimension_semantics = [#tpu.dimension_semantics<parallel>], iteration_bounds = array<i64: 2>, scalar_prefetch = 0 : i64, scratch_operands = 0 : i64, tpu.core_type = #tpu.core_type<tc>, window_params = [{transform_indices = @transform_0, window_bounds = array<i64: 1, 3, 8, 64>}, {transform_indices = @transform_1, window_bounds = array<i64: 4, 3>}, {transform_indices = @transform_2, window_bounds = array<i64: 4>}, {transform_indices = @transform_3, window_bounds = array<i64: 1, 4, 8, 64>}]} {
    %c0 = arith.constant 0 : index
    %c0_0 = arith.constant 0 : index
    %c0_1 = arith.constant 0 : index
    %c0_2 = arith.constant 0 : index
    %0 = vector.load %arg1[%c0, %c0_0, %c0_1, %c0_2] : memref<1x3x8x64xf32, #tpu.memory_space<vmem>>, vector<1x1x8x64xf32>
    %1 = vector.shape_cast %0 : vector<1x1x8x64xf32> to vector<8x64xf32>
    %c0_3 = arith.constant 0 : index
    %c1 = arith.constant 1 : index
    %c0_4 = arith.constant 0 : index
    %c0_5 = arith.constant 0 : index
    %2 = vector.load %arg1[%c0_3, %c1, %c0_4, %c0_5] : memref<1x3x8x64xf32, #tpu.memory_space<vmem>>, vector<1x1x8x64xf32>
    %3 = vector.shape_cast %2 : vector<1x1x8x64xf32> to vector<8x64xf32>
    %c0_6 = arith.constant 0 : index
    %c2 = arith.constant 2 : index
    %c0_7 = arith.constant 0 : index
    %c0_8 = arith.constant 0 : index
    %4 = vector.load %arg1[%c0_6, %c2, %c0_7, %c0_8] : memref<1x3x8x64xf32, #tpu.memory_space<vmem>>, vector<1x1x8x64xf32>
    %5 = vector.shape_cast %4 : vector<1x1x8x64xf32> to vector<8x64xf32>
    %c0_i32 = arith.constant 0 : i32
    %6 = arith.index_cast %c0_i32 : i32 to index
    %c0_9 = arith.constant 0 : index
    %7 = memref.load %arg2[%6, %c0_9] : memref<4x3xf32, #tpu.memory_space<smem>>
    %8 = vector.broadcast %7 : f32 to vector<8x64xf32>
    %9 = arith.mulf %8, %1 : vector<8x64xf32>
    %10 = arith.index_cast %c0_i32 : i32 to index
    %c1_10 = arith.constant 1 : index
    %11 = memref.load %arg2[%10, %c1_10] : memref<4x3xf32, #tpu.memory_space<smem>>
    %12 = vector.broadcast %11 : f32 to vector<8x64xf32>
    %13 = arith.mulf %12, %3 : vector<8x64xf32>
    %14 = arith.addf %9, %13 : vector<8x64xf32>
    %15 = arith.index_cast %c0_i32 : i32 to index
    %c2_11 = arith.constant 2 : index
    %16 = memref.load %arg2[%15, %c2_11] : memref<4x3xf32, #tpu.memory_space<smem>>
    %17 = vector.broadcast %16 : f32 to vector<8x64xf32>
    %18 = arith.mulf %17, %5 : vector<8x64xf32>
    %19 = arith.addf %14, %18 : vector<8x64xf32>
    %20 = arith.index_cast %c0_i32 : i32 to index
    %21 = memref.load %arg3[%20] : memref<4xf32, #tpu.memory_space<smem>>
    %22 = vector.broadcast %21 : f32 to vector<8x64xf32>
    %23 = arith.addf %19, %22 : vector<8x64xf32>
    %cst = arith.constant 2.000000e+01 : f32
    %24 = vector.broadcast %cst : f32 to vector<8x64xf32>
    %25 = arith.cmpf ogt, %23, %24 : vector<8x64xf32>
    %cst_12 = arith.constant 2.000000e+01 : f32
    %26 = vector.broadcast %cst_12 : f32 to vector<8x64xf32>
    %27 = arith.minimumf %23, %26 : vector<8x64xf32>
    %28 = math.exp %27 : vector<8x64xf32>
    %29 = math.log1p %28 : vector<8x64xf32>
    %30 = arith.select %25, %23, %29 : vector<8x64xi1>, vector<8x64xf32>
    %31 = arith.truncf %30 : vector<8x64xf32> to vector<8x64xbf16>
    %c0_13 = arith.constant 0 : index
    %32 = arith.index_cast %c0_i32 : i32 to index
    %c0_14 = arith.constant 0 : index
    %c0_15 = arith.constant 0 : index
    %33 = vector.load %arg4[%c0_13, %32, %c0_14, %c0_15] : memref<1x4x8x64xbf16, #tpu.memory_space<vmem>>, vector<1x1x8x64xbf16>
    %34 = vector.shape_cast %33 : vector<1x1x8x64xbf16> to vector<8x64xbf16>
    %35 = vector.shape_cast %31 : vector<8x64xbf16> to vector<1x1x8x64xbf16>
    tpu.vector_store %arg4[%c0_13, %32, %c0_14, %c0_15], %35 {strides = array<i32>} : memref<1x4x8x64xbf16, #tpu.memory_space<vmem>>, vector<1x1x8x64xbf16>,
    %c1_i32 = arith.constant 1 : i32
    %36 = arith.index_cast %c1_i32 : i32 to index
    %c0_16 = arith.constant 0 : index
    %37 = memref.load %arg2[%36, %c0_16] : memref<4x3xf32, #tpu.memory_space<smem>>
    %38 = vector.broadcast %37 : f32 to vector<8x64xf32>
    %39 = arith.mulf %38, %1 : vector<8x64xf32>
    %40 = arith.index_cast %c1_i32 : i32 to index
    %c1_17 = arith.constant 1 : index
    %41 = memref.load %arg2[%40, %c1_17] : memref<4x3xf32, #tpu.memory_space<smem>>
    %42 = vector.broadcast %41 : f32 to vector<8x64xf32>
    %43 = arith.mulf %42, %3 : vector<8x64xf32>
    %44 = arith.addf %39, %43 : vector<8x64xf32>
    %45 = arith.index_cast %c1_i32 : i32 to index
    %c2_18 = arith.constant 2 : index
    %46 = memref.load %arg2[%45, %c2_18] : memref<4x3xf32, #tpu.memory_space<smem>>
    %47 = vector.broadcast %46 : f32 to vector<8x64xf32>
    %48 = arith.mulf %47, %5 : vector<8x64xf32>
    %49 = arith.addf %44, %48 : vector<8x64xf32>
    %50 = arith.index_cast %c1_i32 : i32 to index
    %51 = memref.load %arg3[%50] : memref<4xf32, #tpu.memory_space<smem>>
    %52 = vector.broadcast %51 : f32 to vector<8x64xf32>
    %53 = arith.addf %49, %52 : vector<8x64xf32>
    %cst_19 = arith.constant 2.000000e+01 : f32
    %54 = vector.broadcast %cst_19 : f32 to vector<8x64xf32>
    %55 = arith.cmpf ogt, %53, %54 : vector<8x64xf32>
    %cst_20 = arith.constant 2.000000e+01 : f32
    %56 = vector.broadcast %cst_20 : f32 to vector<8x64xf32>
    %57 = arith.minimumf %53, %56 : vector<8x64xf32>
    %58 = math.exp %57 : vector<8x64xf32>
    %59 = math.log1p %58 : vector<8x64xf32>
    %60 = arith.select %55, %53, %59 : vector<8x64xi1>, vector<8x64xf32>
    %61 = arith.truncf %60 : vector<8x64xf32> to vector<8x64xbf16>
    %c0_21 = arith.constant 0 : index
    %62 = arith.index_cast %c1_i32 : i32 to index
    %c0_22 = arith.constant 0 : index
    %c0_23 = arith.constant 0 : index
    %63 = vector.load %arg4[%c0_21, %62, %c0_22, %c0_23] : memref<1x4x8x64xbf16, #tpu.memory_space<vmem>>, vector<1x1x8x64xbf16>
    %64 = vector.shape_cast %63 : vector<1x1x8x64xbf16> to vector<8x64xbf16>
    %65 = vector.shape_cast %61 : vector<8x64xbf16> to vector<1x1x8x64xbf16>
    tpu.vector_store %arg4[%c0_21, %62, %c0_22, %c0_23], %65 {strides = array<i32>} : memref<1x4x8x64xbf16, #tpu.memory_space<vmem>>, vector<1x1x8x64xbf16>,
    %c2_i32 = arith.constant 2 : i32
    %66 = arith.index_cast %c2_i32 : i32 to index
    %c0_24 = arith.constant 0 : index
    %67 = memref.load %arg2[%66, %c0_24] : memref<4x3xf32, #tpu.memory_space<smem>>
    %68 = vector.broadcast %67 : f32 to vector<8x64xf32>
    %69 = arith.mulf %68, %1 : vector<8x64xf32>
    %70 = arith.index_cast %c2_i32 : i32 to index
    %c1_25 = arith.constant 1 : index
    %71 = memref.load %arg2[%70, %c1_25] : memref<4x3xf32, #tpu.memory_space<smem>>
    %72 = vector.broadcast %71 : f32 to vector<8x64xf32>
    %73 = arith.mulf %72, %3 : vector<8x64xf32>
    %74 = arith.addf %69, %73 : vector<8x64xf32>
    %75 = arith.index_cast %c2_i32 : i32 to index
    %c2_26 = arith.constant 2 : index
    %76 = memref.load %arg2[%75, %c2_26] : memref<4x3xf32, #tpu.memory_space<smem>>
    %77 = vector.broadcast %76 : f32 to vector<8x64xf32>
    %78 = arith.mulf %77, %5 : vector<8x64xf32>
    %79 = arith.addf %74, %78 : vector<8x64xf32>
    %80 = arith.index_cast %c2_i32 : i32 to index
    %81 = memref.load %arg3[%80] : memref<4xf32, #tpu.memory_space<smem>>
    %82 = vector.broadcast %81 : f32 to vector<8x64xf32>
    %83 = arith.addf %79, %82 : vector<8x64xf32>
    %cst_27 = arith.constant 2.000000e+01 : f32
    %84 = vector.broadcast %cst_27 : f32 to vector<8x64xf32>
    %85 = arith.cmpf ogt, %83, %84 : vector<8x64xf32>
    %cst_28 = arith.constant 2.000000e+01 : f32
    %86 = vector.broadcast %cst_28 : f32 to vector<8x64xf32>
    %87 = arith.minimumf %83, %86 : vector<8x64xf32>
    %88 = math.exp %87 : vector<8x64xf32>
    %89 = math.log1p %88 : vector<8x64xf32>
    %90 = arith.select %85, %83, %89 : vector<8x64xi1>, vector<8x64xf32>
    %91 = arith.truncf %90 : vector<8x64xf32> to vector<8x64xbf16>
    %c0_29 = arith.constant 0 : index
    %92 = arith.index_cast %c2_i32 : i32 to index
    %c0_30 = arith.constant 0 : index
    %c0_31 = arith.constant 0 : index
    %93 = vector.load %arg4[%c0_29, %92, %c0_30, %c0_31] : memref<1x4x8x64xbf16, #tpu.memory_space<vmem>>, vector<1x1x8x64xbf16>
    %94 = vector.shape_cast %93 : vector<1x1x8x64xbf16> to vector<8x64xbf16>
    %95 = vector.shape_cast %91 : vector<8x64xbf16> to vector<1x1x8x64xbf16>
    tpu.vector_store %arg4[%c0_29, %92, %c0_30, %c0_31], %95 {strides = array<i32>} : memref<1x4x8x64xbf16, #tpu.memory_space<vmem>>, vector<1x1x8x64xbf16>,
    %c3_i32 = arith.constant 3 : i32
    %96 = arith.index_cast %c3_i32 : i32 to index
    %c0_32 = arith.constant 0 : index
    %97 = memref.load %arg2[%96, %c0_32] : memref<4x3xf32, #tpu.memory_space<smem>>
    %98 = vector.broadcast %97 : f32 to vector<8x64xf32>
    %99 = arith.mulf %98, %1 : vector<8x64xf32>
    %100 = arith.index_cast %c3_i32 : i32 to index
    %c1_33 = arith.constant 1 : index
    %101 = memref.load %arg2[%100, %c1_33] : memref<4x3xf32, #tpu.memory_space<smem>>
    %102 = vector.broadcast %101 : f32 to vector<8x64xf32>
    %103 = arith.mulf %102, %3 : vector<8x64xf32>
    %104 = arith.addf %99, %103 : vector<8x64xf32>
    %105 = arith.index_cast %c3_i32 : i32 to index
    %c2_34 = arith.constant 2 : index
    %106 = memref.load %arg2[%105, %c2_34] : memref<4x3xf32, #tpu.memory_space<smem>>
    %107 = vector.broadcast %106 : f32 to vector<8x64xf32>
    %108 = arith.mulf %107, %5 : vector<8x64xf32>
    %109 = arith.addf %104, %108 : vector<8x64xf32>
    %110 = arith.index_cast %c3_i32 : i32 to index
    %111 = memref.load %arg3[%110] : memref<4xf32, #tpu.memory_space<smem>>
    %112 = vector.broadcast %111 : f32 to vector<8x64xf32>
    %113 = arith.addf %109, %112 : vector<8x64xf32>
    %cst_35 = arith.constant 2.000000e+01 : f32
    %114 = vector.broadcast %cst_35 : f32 to vector<8x64xf32>
    %115 = arith.cmpf ogt, %113, %114 : vector<8x64xf32>
    %cst_36 = arith.constant 2.000000e+01 : f32
    %116 = vector.broadcast %cst_36 : f32 to vector<8x64xf32>
    %117 = arith.minimumf %113, %116 : vector<8x64xf32>
    %118 = math.exp %117 : vector<8x64xf32>
    %119 = math.log1p %118 : vector<8x64xf32>
    %120 = arith.select %115, %113, %119 : vector<8x64xi1>, vector<8x64xf32>
    %121 = arith.truncf %120 : vector<8x64xf32> to vector<8x64xbf16>
    %c0_37 = arith.constant 0 : index
    %122 = arith.index_cast %c3_i32 : i32 to index
    %c0_38 = arith.constant 0 : index
    %c0_39 = arith.constant 0 : index
    %123 = vector.load %arg4[%c0_37, %122, %c0_38, %c0_39] : memref<1x4x8x64xbf16, #tpu.memory_space<vmem>>, vector<1x1x8x64xbf16>
    %124 = vector.shape_cast %123 : vector<1x1x8x64xbf16> to vector<8x64xbf16>
    %125 = vector.shape_cast %121 : vector<8x64xbf16> to vector<1x1x8x64xbf16>
    tpu.vector_store %arg4[%c0_37, %122, %c0_38, %c0_39], %125 {strides = array<i32>} : memref<1x4x8x64xbf16, #tpu.memory_space<vmem>>, vector<1x1x8x64xbf16>,
    %c4_i32 = arith.constant 4 : i32
    return
  }
  func.func @transform_0(%arg0: i32) -> (i32, i32, i32, i32) {
    %c0_i32 = arith.constant 0 : i32
    %c0_i32_0 = arith.constant 0 : i32
    %c0_i32_1 = arith.constant 0 : i32
    %c0_i32_2 = arith.constant 0 : i32
    return %arg0, %c0_i32, %c0_i32_0, %c0_i32_1 : i32, i32, i32, i32
  }
  func.func @transform_1(%arg0: i32) -> (i32, i32) {
    %c0_i32 = arith.constant 0 : i32
    %c0_i32_0 = arith.constant 0 : i32
    %c0_i32_1 = arith.constant 0 : i32
    return %c0_i32, %c0_i32_0 : i32, i32
  }
  func.func @transform_2(%arg0: i32) -> i32 {
    %c0_i32 = arith.constant 0 : i32
    %c0_i32_0 = arith.constant 0 : i32
    return %c0_i32 : i32
  }
  func.func @transform_3(%arg0: i32) -> (i32, i32, i32, i32) {
    %c0_i32 = arith.constant 0 : i32
    %c0_i32_0 = arith.constant 0 : i32
    %c0_i32_1 = arith.constant 0 : i32
    %c0_i32_2 = arith.constant 0 : i32
    return %arg0, %c0_i32, %c0_i32_0, %c0_i32_1 : i32, i32, i32, i32
  }
}

module attributes {stable_mosaic.version = 11 : i64} {
  func.func @qkv_proj_kernel(%arg0: i32, %arg1: i32, %arg2: memref<1x32x64xbf16, #tpu.memory_space<vmem>>, %arg3: memref<96x32xbf16, #tpu.memory_space<vmem>>, %arg4: memref<1x96x64xf32, #tpu.memory_space<vmem>>) attributes {dimension_semantics = [#tpu.dimension_semantics<parallel>, #tpu.dimension_semantics<arbitrary>], iteration_bounds = array<i64: 2, 1>, scalar_prefetch = 0 : i64, scratch_operands = 0 : i64, tpu.core_type = #tpu.core_type<tc>, window_params = [{transform_indices = @transform_0, window_bounds = array<i64: 1, 32, 64>}, {pipeline_mode = #tpu.pipeline_mode<synchronous>, transform_indices = @transform_1, window_bounds = array<i64: 96, 32>}, {transform_indices = @transform_2, window_bounds = array<i64: 1, 96, 64>}]} {
    %c0 = arith.constant 0 : index
    %c0_0 = arith.constant 0 : index
    %0 = vector.load %arg3[%c0, %c0_0] : memref<96x32xbf16, #tpu.memory_space<vmem>>, vector<96x32xbf16>
    %c0_1 = arith.constant 0 : index
    %c0_2 = arith.constant 0 : index
    %c0_3 = arith.constant 0 : index
    %1 = vector.load %arg2[%c0_1, %c0_2, %c0_3] : memref<1x32x64xbf16, #tpu.memory_space<vmem>>, vector<1x32x64xbf16>
    %2 = vector.shape_cast %1 : vector<1x32x64xbf16> to vector<32x64xbf16>
    %cst = arith.constant dense<0.000000e+00> : vector<96x64xf32>
    %3 = tpu.matmul %0, %2, %cst {dimension_numbers = #tpu.dot_dimension_numbers<[1], [0], [0], [1], [0, 0, 1, 1], [], []>} : vector<96x32xbf16>, vector<32x64xbf16>, vector<96x64xf32> -> vector<96x64xf32>
    %c0_4 = arith.constant 0 : index
    %c0_5 = arith.constant 0 : index
    %c0_6 = arith.constant 0 : index
    %4 = vector.load %arg4[%c0_4, %c0_5, %c0_6] : memref<1x96x64xf32, #tpu.memory_space<vmem>>, vector<1x96x64xf32>
    %5 = vector.shape_cast %4 : vector<1x96x64xf32> to vector<96x64xf32>
    %6 = vector.shape_cast %3 : vector<96x64xf32> to vector<1x96x64xf32>
    tpu.vector_store %arg4[%c0_4, %c0_5, %c0_6], %6 {strides = array<i32>} : memref<1x96x64xf32, #tpu.memory_space<vmem>>, vector<1x96x64xf32>,
    return
  }
  func.func @transform_0(%arg0: i32, %arg1: i32) -> (i32, i32, i32) {
    %c0_i32 = arith.constant 0 : i32
    %c0_i32_0 = arith.constant 0 : i32
    return %arg0, %c0_i32, %arg1 : i32, i32, i32
  }
  func.func @transform_1(%arg0: i32, %arg1: i32) -> (i32, i32) {
    %c0_i32 = arith.constant 0 : i32
    %c0_i32_0 = arith.constant 0 : i32
    %c0_i32_1 = arith.constant 0 : i32
    return %c0_i32, %c0_i32_0 : i32, i32
  }
  func.func @transform_2(%arg0: i32, %arg1: i32) -> (i32, i32, i32) {
    %c0_i32 = arith.constant 0 : i32
    %c0_i32_0 = arith.constant 0 : i32
    return %arg0, %c0_i32, %arg1 : i32, i32, i32
  }
}

module attributes {stable_mosaic.version = 11 : i64} {
  func.func @lambda_core_kernel(%arg0: i32, %arg1: i32, %arg2: memref<1x4x8x64xf32, #tpu.memory_space<vmem>>, %arg3: memref<1x8x256xbf16, #tpu.memory_space<vmem>>, %arg4: memref<1x8x8xf32, #tpu.memory_space<vmem>>, %arg5: memref<1x256x512xbf16, #tpu.memory_space<vmem>>, %arg6: memref<4x8x64xf32, #tpu.memory_space<vmem>>, %arg7: memref<1x1x8x128xf32, #tpu.memory_space<vmem>>) attributes {dimension_semantics = [#tpu.dimension_semantics<parallel>, #tpu.dimension_semantics<arbitrary>], iteration_bounds = array<i64: 1, 2>, scalar_prefetch = 0 : i64, scratch_operands = 0 : i64, tpu.core_type = #tpu.core_type<tc>, window_params = [{transform_indices = @transform_0, window_bounds = array<i64: 1, 4, 8, 64>}, {transform_indices = @transform_1, window_bounds = array<i64: 1, 8, 256>}, {transform_indices = @transform_2, window_bounds = array<i64: 1, 8, 8>}, {transform_indices = @transform_3, window_bounds = array<i64: 1, 256, 512>}, {transform_indices = @transform_4, window_bounds = array<i64: 4, 8, 64>}, {transform_indices = @transform_5, window_bounds = array<i64: 1, 1, 8, 128>}]} {
    %c0 = arith.constant 0 : index
    %c0_0 = arith.constant 0 : index
    %c0_1 = arith.constant 0 : index
    %0 = vector.load %arg3[%c0, %c0_0, %c0_1] : memref<1x8x256xbf16, #tpu.memory_space<vmem>>, vector<1x8x256xbf16>
    %1 = vector.shape_cast %0 : vector<1x8x256xbf16> to vector<8x256xbf16>
    %c0_2 = arith.constant 0 : index
    %c0_3 = arith.constant 0 : index
    %c0_4 = arith.constant 0 : index
    %2 = vector.load %arg5[%c0_2, %c0_3, %c0_4] : memref<1x256x512xbf16, #tpu.memory_space<vmem>>, vector<1x256x512xbf16>
    %3 = vector.shape_cast %2 : vector<1x256x512xbf16> to vector<256x512xbf16>
    %cst = arith.constant dense<0.000000e+00> : vector<8x512xf32>
    %4 = tpu.matmul %1, %3, %cst {dimension_numbers = #tpu.dot_dimension_numbers<[1], [0], [0], [1], [0, 0, 1, 1], [], []>} : vector<8x256xbf16>, vector<256x512xbf16>, vector<8x512xf32> -> vector<8x512xf32>
    %c0_5 = arith.constant 0 : index
    %c0_6 = arith.constant 0 : index
    %c0_7 = arith.constant 0 : index
    %c0_8 = arith.constant 0 : index
    %5 = vector.load %arg2[%c0_5, %c0_6, %c0_7, %c0_8] : memref<1x4x8x64xf32, #tpu.memory_space<vmem>>, vector<1x4x8x64xf32>
    %6 = vector.shape_cast %5 : vector<1x4x8x64xf32> to vector<4x8x64xf32>
    %c0_9 = arith.constant 0 : index
    %c0_10 = arith.constant 0 : index
    %c0_11 = arith.constant 0 : index
    %7 = vector.load %arg4[%c0_9, %c0_10, %c0_11] : memref<1x8x8xf32, #tpu.memory_space<vmem>>, vector<1x8x8xf32>
    %8 = vector.shape_cast %7 : vector<1x8x8xf32> to vector<8x8xf32>
    %c0_12 = arith.constant 0 : index
    %c0_13 = arith.constant 0 : index
    %c0_14 = arith.constant 0 : index
    %9 = vector.load %arg6[%c0_12, %c0_13, %c0_14] : memref<4x8x64xf32, #tpu.memory_space<vmem>>, vector<4x8x64xf32>
    %cst_15 = arith.constant 0.000000e+00 : f32
    %10 = vector.broadcast %cst_15 : f32 to vector<8x64xf32>
    %11 = vector.extract_strided_slice %9 {offsets = [0, 0, 0], sizes = [1, 8, 64], strides = [1, 1, 1]} : vector<4x8x64xf32> to vector<1x8x64xf32>
    %12 = vector.shape_cast %11 : vector<1x8x64xf32> to vector<8x64xf32>
    %13 = vector.extract_strided_slice %6 {offsets = [0, 0, 0], sizes = [1, 1, 64], strides = [1, 1, 1]} : vector<4x8x64xf32> to vector<1x1x64xf32>
    %14 = vector.shape_cast %13 : vector<1x1x64xf32> to vector<64xf32>
    %15 = vector.shape_cast %14 : vector<64xf32> to vector<1x64xf32>
    %16 = vector.broadcast %15 : vector<1x64xf32> to vector<8x64xf32>
    %17 = arith.mulf %12, %16 : vector<8x64xf32>
    %18 = vector.extract_strided_slice %9 {offsets = [1, 0, 0], sizes = [1, 8, 64], strides = [1, 1, 1]} : vector<4x8x64xf32> to vector<1x8x64xf32>
    %19 = vector.shape_cast %18 : vector<1x8x64xf32> to vector<8x64xf32>
    %20 = vector.extract_strided_slice %6 {offsets = [1, 0, 0], sizes = [1, 1, 64], strides = [1, 1, 1]} : vector<4x8x64xf32> to vector<1x1x64xf32>
    %21 = vector.shape_cast %20 : vector<1x1x64xf32> to vector<64xf32>
    %22 = vector.shape_cast %21 : vector<64xf32> to vector<1x64xf32>
    %23 = vector.broadcast %22 : vector<1x64xf32> to vector<8x64xf32>
    %24 = arith.mulf %19, %23 : vector<8x64xf32>
    %25 = arith.addf %17, %24 : vector<8x64xf32>
    %26 = vector.extract_strided_slice %9 {offsets = [2, 0, 0], sizes = [1, 8, 64], strides = [1, 1, 1]} : vector<4x8x64xf32> to vector<1x8x64xf32>
    %27 = vector.shape_cast %26 : vector<1x8x64xf32> to vector<8x64xf32>
    %28 = vector.extract_strided_slice %6 {offsets = [2, 0, 0], sizes = [1, 1, 64], strides = [1, 1, 1]} : vector<4x8x64xf32> to vector<1x1x64xf32>
    %29 = vector.shape_cast %28 : vector<1x1x64xf32> to vector<64xf32>
    %30 = vector.shape_cast %29 : vector<64xf32> to vector<1x64xf32>
    %31 = vector.broadcast %30 : vector<1x64xf32> to vector<8x64xf32>
    %32 = arith.mulf %27, %31 : vector<8x64xf32>
    %33 = arith.addf %25, %32 : vector<8x64xf32>
    %34 = vector.extract_strided_slice %9 {offsets = [3, 0, 0], sizes = [1, 8, 64], strides = [1, 1, 1]} : vector<4x8x64xf32> to vector<1x8x64xf32>
    %35 = vector.shape_cast %34 : vector<1x8x64xf32> to vector<8x64xf32>
    %36 = vector.extract_strided_slice %6 {offsets = [3, 0, 0], sizes = [1, 1, 64], strides = [1, 1, 1]} : vector<4x8x64xf32> to vector<1x1x64xf32>
    %37 = vector.shape_cast %36 : vector<1x1x64xf32> to vector<64xf32>
    %38 = vector.shape_cast %37 : vector<64xf32> to vector<1x64xf32>
    %39 = vector.broadcast %38 : vector<1x64xf32> to vector<8x64xf32>
    %40 = arith.mulf %35, %39 : vector<8x64xf32>
    %41 = arith.addf %33, %40 : vector<8x64xf32>
    %42 = vector.extract_strided_slice %4 {offsets = [0, 0], sizes = [8, 64], strides = [1, 1]} : vector<8x512xf32> to vector<8x64xf32>
    %43 = vector.extract_strided_slice %8 {offsets = [0, 0], sizes = [8, 1], strides = [1, 1]} : vector<8x8xf32> to vector<8x1xf32>
    %44 = vector.broadcast %43 : vector<8x1xf32> to vector<8x64xf32>
    %45 = arith.addf %42, %44 : vector<8x64xf32>
    %46 = arith.mulf %45, %41 : vector<8x64xf32>
    %47 = arith.addf %10, %46 : vector<8x64xf32>
    %48 = vector.extract_strided_slice %9 {offsets = [0, 0, 0], sizes = [1, 8, 64], strides = [1, 1, 1]} : vector<4x8x64xf32> to vector<1x8x64xf32>
    %49 = vector.shape_cast %48 : vector<1x8x64xf32> to vector<8x64xf32>
    %50 = vector.extract_strided_slice %6 {offsets = [0, 1, 0], sizes = [1, 1, 64], strides = [1, 1, 1]} : vector<4x8x64xf32> to vector<1x1x64xf32>
    %51 = vector.shape_cast %50 : vector<1x1x64xf32> to vector<64xf32>
    %52 = vector.shape_cast %51 : vector<64xf32> to vector<1x64xf32>
    %53 = vector.broadcast %52 : vector<1x64xf32> to vector<8x64xf32>
    %54 = arith.mulf %49, %53 : vector<8x64xf32>
    %55 = vector.extract_strided_slice %9 {offsets = [1, 0, 0], sizes = [1, 8, 64], strides = [1, 1, 1]} : vector<4x8x64xf32> to vector<1x8x64xf32>
    %56 = vector.shape_cast %55 : vector<1x8x64xf32> to vector<8x64xf32>
    %57 = vector.extract_strided_slice %6 {offsets = [1, 1, 0], sizes = [1, 1, 64], strides = [1, 1, 1]} : vector<4x8x64xf32> to vector<1x1x64xf32>
    %58 = vector.shape_cast %57 : vector<1x1x64xf32> to vector<64xf32>
    %59 = vector.shape_cast %58 : vector<64xf32> to vector<1x64xf32>
    %60 = vector.broadcast %59 : vector<1x64xf32> to vector<8x64xf32>
    %61 = arith.mulf %56, %60 : vector<8x64xf32>
    %62 = arith.addf %54, %61 : vector<8x64xf32>
    %63 = vector.extract_strided_slice %9 {offsets = [2, 0, 0], sizes = [1, 8, 64], strides = [1, 1, 1]} : vector<4x8x64xf32> to vector<1x8x64xf32>
    %64 = vector.shape_cast %63 : vector<1x8x64xf32> to vector<8x64xf32>
    %65 = vector.extract_strided_slice %6 {offsets = [2, 1, 0], sizes = [1, 1, 64], strides = [1, 1, 1]} : vector<4x8x64xf32> to vector<1x1x64xf32>
    %66 = vector.shape_cast %65 : vector<1x1x64xf32> to vector<64xf32>
    %67 = vector.shape_cast %66 : vector<64xf32> to vector<1x64xf32>
    %68 = vector.broadcast %67 : vector<1x64xf32> to vector<8x64xf32>
    %69 = arith.mulf %64, %68 : vector<8x64xf32>
    %70 = arith.addf %62, %69 : vector<8x64xf32>
    %71 = vector.extract_strided_slice %9 {offsets = [3, 0, 0], sizes = [1, 8, 64], strides = [1, 1, 1]} : vector<4x8x64xf32> to vector<1x8x64xf32>
    %72 = vector.shape_cast %71 : vector<1x8x64xf32> to vector<8x64xf32>
    %73 = vector.extract_strided_slice %6 {offsets = [3, 1, 0], sizes = [1, 1, 64], strides = [1, 1, 1]} : vector<4x8x64xf32> to vector<1x1x64xf32>
    %74 = vector.shape_cast %73 : vector<1x1x64xf32> to vector<64xf32>
    %75 = vector.shape_cast %74 : vector<64xf32> to vector<1x64xf32>
    %76 = vector.broadcast %75 : vector<1x64xf32> to vector<8x64xf32>
    %77 = arith.mulf %72, %76 : vector<8x64xf32>
    %78 = arith.addf %70, %77 : vector<8x64xf32>
    %79 = vector.extract_strided_slice %4 {offsets = [0, 64], sizes = [8, 64], strides = [1, 1]} : vector<8x512xf32> to vector<8x64xf32>
    %80 = vector.extract_strided_slice %8 {offsets = [0, 1], sizes = [8, 1], strides = [1, 1]} : vector<8x8xf32> to vector<8x1xf32>
    %81 = vector.broadcast %80 : vector<8x1xf32> to vector<8x64xf32>
    %82 = arith.addf %79, %81 : vector<8x64xf32>
    %83 = arith.mulf %82, %78 : vector<8x64xf32>
    %84 = arith.addf %47, %83 : vector<8x64xf32>
    %85 = vector.extract_strided_slice %9 {offsets = [0, 0, 0], sizes = [1, 8, 64], strides = [1, 1, 1]} : vector<4x8x64xf32> to vector<1x8x64xf32>
    %86 = vector.shape_cast %85 : vector<1x8x64xf32> to vector<8x64xf32>
    %87 = vector.extract_strided_slice %6 {offsets = [0, 2, 0], sizes = [1, 1, 64], strides = [1, 1, 1]} : vector<4x8x64xf32> to vector<1x1x64xf32>
    %88 = vector.shape_cast %87 : vector<1x1x64xf32> to vector<64xf32>
    %89 = vector.shape_cast %88 : vector<64xf32> to vector<1x64xf32>
    %90 = vector.broadcast %89 : vector<1x64xf32> to vector<8x64xf32>
    %91 = arith.mulf %86, %90 : vector<8x64xf32>
    %92 = vector.extract_strided_slice %9 {offsets = [1, 0, 0], sizes = [1, 8, 64], strides = [1, 1, 1]} : vector<4x8x64xf32> to vector<1x8x64xf32>
    %93 = vector.shape_cast %92 : vector<1x8x64xf32> to vector<8x64xf32>
    %94 = vector.extract_strided_slice %6 {offsets = [1, 2, 0], sizes = [1, 1, 64], strides = [1, 1, 1]} : vector<4x8x64xf32> to vector<1x1x64xf32>
    %95 = vector.shape_cast %94 : vector<1x1x64xf32> to vector<64xf32>
    %96 = vector.shape_cast %95 : vector<64xf32> to vector<1x64xf32>
    %97 = vector.broadcast %96 : vector<1x64xf32> to vector<8x64xf32>
    %98 = arith.mulf %93, %97 : vector<8x64xf32>
    %99 = arith.addf %91, %98 : vector<8x64xf32>
    %100 = vector.extract_strided_slice %9 {offsets = [2, 0, 0], sizes = [1, 8, 64], strides = [1, 1, 1]} : vector<4x8x64xf32> to vector<1x8x64xf32>
    %101 = vector.shape_cast %100 : vector<1x8x64xf32> to vector<8x64xf32>
    %102 = vector.extract_strided_slice %6 {offsets = [2, 2, 0], sizes = [1, 1, 64], strides = [1, 1, 1]} : vector<4x8x64xf32> to vector<1x1x64xf32>
    %103 = vector.shape_cast %102 : vector<1x1x64xf32> to vector<64xf32>
    %104 = vector.shape_cast %103 : vector<64xf32> to vector<1x64xf32>
    %105 = vector.broadcast %104 : vector<1x64xf32> to vector<8x64xf32>
    %106 = arith.mulf %101, %105 : vector<8x64xf32>
    %107 = arith.addf %99, %106 : vector<8x64xf32>
    %108 = vector.extract_strided_slice %9 {offsets = [3, 0, 0], sizes = [1, 8, 64], strides = [1, 1, 1]} : vector<4x8x64xf32> to vector<1x8x64xf32>
    %109 = vector.shape_cast %108 : vector<1x8x64xf32> to vector<8x64xf32>
    %110 = vector.extract_strided_slice %6 {offsets = [3, 2, 0], sizes = [1, 1, 64], strides = [1, 1, 1]} : vector<4x8x64xf32> to vector<1x1x64xf32>
    %111 = vector.shape_cast %110 : vector<1x1x64xf32> to vector<64xf32>
    %112 = vector.shape_cast %111 : vector<64xf32> to vector<1x64xf32>
    %113 = vector.broadcast %112 : vector<1x64xf32> to vector<8x64xf32>
    %114 = arith.mulf %109, %113 : vector<8x64xf32>
    %115 = arith.addf %107, %114 : vector<8x64xf32>
    %116 = vector.extract_strided_slice %4 {offsets = [0, 128], sizes = [8, 64], strides = [1, 1]} : vector<8x512xf32> to vector<8x64xf32>
    %117 = vector.extract_strided_slice %8 {offsets = [0, 2], sizes = [8, 1], strides = [1, 1]} : vector<8x8xf32> to vector<8x1xf32>
    %118 = vector.broadcast %117 : vector<8x1xf32> to vector<8x64xf32>
    %119 = arith.addf %116, %118 : vector<8x64xf32>
    %120 = arith.mulf %119, %115 : vector<8x64xf32>
    %121 = arith.addf %84, %120 : vector<8x64xf32>
    %122 = vector.extract_strided_slice %9 {offsets = [0, 0, 0], sizes = [1, 8, 64], strides = [1, 1, 1]} : vector<4x8x64xf32> to vector<1x8x64xf32>
    %123 = vector.shape_cast %122 : vector<1x8x64xf32> to vector<8x64xf32>
    %124 = vector.extract_strided_slice %6 {offsets = [0, 3, 0], sizes = [1, 1, 64], strides = [1, 1, 1]} : vector<4x8x64xf32> to vector<1x1x64xf32>
    %125 = vector.shape_cast %124 : vector<1x1x64xf32> to vector<64xf32>
    %126 = vector.shape_cast %125 : vector<64xf32> to vector<1x64xf32>
    %127 = vector.broadcast %126 : vector<1x64xf32> to vector<8x64xf32>
    %128 = arith.mulf %123, %127 : vector<8x64xf32>
    %129 = vector.extract_strided_slice %9 {offsets = [1, 0, 0], sizes = [1, 8, 64], strides = [1, 1, 1]} : vector<4x8x64xf32> to vector<1x8x64xf32>
    %130 = vector.shape_cast %129 : vector<1x8x64xf32> to vector<8x64xf32>
    %131 = vector.extract_strided_slice %6 {offsets = [1, 3, 0], sizes = [1, 1, 64], strides = [1, 1, 1]} : vector<4x8x64xf32> to vector<1x1x64xf32>
    %132 = vector.shape_cast %131 : vector<1x1x64xf32> to vector<64xf32>
    %133 = vector.shape_cast %132 : vector<64xf32> to vector<1x64xf32>
    %134 = vector.broadcast %133 : vector<1x64xf32> to vector<8x64xf32>
    %135 = arith.mulf %130, %134 : vector<8x64xf32>
    %136 = arith.addf %128, %135 : vector<8x64xf32>
    %137 = vector.extract_strided_slice %9 {offsets = [2, 0, 0], sizes = [1, 8, 64], strides = [1, 1, 1]} : vector<4x8x64xf32> to vector<1x8x64xf32>
    %138 = vector.shape_cast %137 : vector<1x8x64xf32> to vector<8x64xf32>
    %139 = vector.extract_strided_slice %6 {offsets = [2, 3, 0], sizes = [1, 1, 64], strides = [1, 1, 1]} : vector<4x8x64xf32> to vector<1x1x64xf32>
    %140 = vector.shape_cast %139 : vector<1x1x64xf32> to vector<64xf32>
    %141 = vector.shape_cast %140 : vector<64xf32> to vector<1x64xf32>
    %142 = vector.broadcast %141 : vector<1x64xf32> to vector<8x64xf32>
    %143 = arith.mulf %138, %142 : vector<8x64xf32>
    %144 = arith.addf %136, %143 : vector<8x64xf32>
    %145 = vector.extract_strided_slice %9 {offsets = [3, 0, 0], sizes = [1, 8, 64], strides = [1, 1, 1]} : vector<4x8x64xf32> to vector<1x8x64xf32>
    %146 = vector.shape_cast %145 : vector<1x8x64xf32> to vector<8x64xf32>
    %147 = vector.extract_strided_slice %6 {offsets = [3, 3, 0], sizes = [1, 1, 64], strides = [1, 1, 1]} : vector<4x8x64xf32> to vector<1x1x64xf32>
    %148 = vector.shape_cast %147 : vector<1x1x64xf32> to vector<64xf32>
    %149 = vector.shape_cast %148 : vector<64xf32> to vector<1x64xf32>
    %150 = vector.broadcast %149 : vector<1x64xf32> to vector<8x64xf32>
    %151 = arith.mulf %146, %150 : vector<8x64xf32>
    %152 = arith.addf %144, %151 : vector<8x64xf32>
    %153 = vector.extract_strided_slice %4 {offsets = [0, 192], sizes = [8, 64], strides = [1, 1]} : vector<8x512xf32> to vector<8x64xf32>
    %154 = vector.extract_strided_slice %8 {offsets = [0, 3], sizes = [8, 1], strides = [1, 1]} : vector<8x8xf32> to vector<8x1xf32>
    %155 = vector.broadcast %154 : vector<8x1xf32> to vector<8x64xf32>
    %156 = arith.addf %153, %155 : vector<8x64xf32>
    %157 = arith.mulf %156, %152 : vector<8x64xf32>
    %158 = arith.addf %121, %157 : vector<8x64xf32>
    %159 = vector.extract_strided_slice %9 {offsets = [0, 0, 0], sizes = [1, 8, 64], strides = [1, 1, 1]} : vector<4x8x64xf32> to vector<1x8x64xf32>
    %160 = vector.shape_cast %159 : vector<1x8x64xf32> to vector<8x64xf32>
    %161 = vector.extract_strided_slice %6 {offsets = [0, 4, 0], sizes = [1, 1, 64], strides = [1, 1, 1]} : vector<4x8x64xf32> to vector<1x1x64xf32>
    %162 = vector.shape_cast %161 : vector<1x1x64xf32> to vector<64xf32>
    %163 = vector.shape_cast %162 : vector<64xf32> to vector<1x64xf32>
    %164 = vector.broadcast %163 : vector<1x64xf32> to vector<8x64xf32>
    %165 = arith.mulf %160, %164 : vector<8x64xf32>
    %166 = vector.extract_strided_slice %9 {offsets = [1, 0, 0], sizes = [1, 8, 64], strides = [1, 1, 1]} : vector<4x8x64xf32> to vector<1x8x64xf32>
    %167 = vector.shape_cast %166 : vector<1x8x64xf32> to vector<8x64xf32>
    %168 = vector.extract_strided_slice %6 {offsets = [1, 4, 0], sizes = [1, 1, 64], strides = [1, 1, 1]} : vector<4x8x64xf32> to vector<1x1x64xf32>
    %169 = vector.shape_cast %168 : vector<1x1x64xf32> to vector<64xf32>
    %170 = vector.shape_cast %169 : vector<64xf32> to vector<1x64xf32>
    %171 = vector.broadcast %170 : vector<1x64xf32> to vector<8x64xf32>
    %172 = arith.mulf %167, %171 : vector<8x64xf32>
    %173 = arith.addf %165, %172 : vector<8x64xf32>
    %174 = vector.extract_strided_slice %9 {offsets = [2, 0, 0], sizes = [1, 8, 64], strides = [1, 1, 1]} : vector<4x8x64xf32> to vector<1x8x64xf32>
    %175 = vector.shape_cast %174 : vector<1x8x64xf32> to vector<8x64xf32>
    %176 = vector.extract_strided_slice %6 {offsets = [2, 4, 0], sizes = [1, 1, 64], strides = [1, 1, 1]} : vector<4x8x64xf32> to vector<1x1x64xf32>
    %177 = vector.shape_cast %176 : vector<1x1x64xf32> to vector<64xf32>
    %178 = vector.shape_cast %177 : vector<64xf32> to vector<1x64xf32>
    %179 = vector.broadcast %178 : vector<1x64xf32> to vector<8x64xf32>
    %180 = arith.mulf %175, %179 : vector<8x64xf32>
    %181 = arith.addf %173, %180 : vector<8x64xf32>
    %182 = vector.extract_strided_slice %9 {offsets = [3, 0, 0], sizes = [1, 8, 64], strides = [1, 1, 1]} : vector<4x8x64xf32> to vector<1x8x64xf32>
    %183 = vector.shape_cast %182 : vector<1x8x64xf32> to vector<8x64xf32>
    %184 = vector.extract_strided_slice %6 {offsets = [3, 4, 0], sizes = [1, 1, 64], strides = [1, 1, 1]} : vector<4x8x64xf32> to vector<1x1x64xf32>
    %185 = vector.shape_cast %184 : vector<1x1x64xf32> to vector<64xf32>
    %186 = vector.shape_cast %185 : vector<64xf32> to vector<1x64xf32>
    %187 = vector.broadcast %186 : vector<1x64xf32> to vector<8x64xf32>
    %188 = arith.mulf %183, %187 : vector<8x64xf32>
    %189 = arith.addf %181, %188 : vector<8x64xf32>
    %190 = vector.extract_strided_slice %4 {offsets = [0, 256], sizes = [8, 64], strides = [1, 1]} : vector<8x512xf32> to vector<8x64xf32>
    %191 = vector.extract_strided_slice %8 {offsets = [0, 4], sizes = [8, 1], strides = [1, 1]} : vector<8x8xf32> to vector<8x1xf32>
    %192 = vector.broadcast %191 : vector<8x1xf32> to vector<8x64xf32>
    %193 = arith.addf %190, %192 : vector<8x64xf32>
    %194 = arith.mulf %193, %189 : vector<8x64xf32>
    %195 = arith.addf %158, %194 : vector<8x64xf32>
    %196 = vector.extract_strided_slice %9 {offsets = [0, 0, 0], sizes = [1, 8, 64], strides = [1, 1, 1]} : vector<4x8x64xf32> to vector<1x8x64xf32>
    %197 = vector.shape_cast %196 : vector<1x8x64xf32> to vector<8x64xf32>
    %198 = vector.extract_strided_slice %6 {offsets = [0, 5, 0], sizes = [1, 1, 64], strides = [1, 1, 1]} : vector<4x8x64xf32> to vector<1x1x64xf32>
    %199 = vector.shape_cast %198 : vector<1x1x64xf32> to vector<64xf32>
    %200 = vector.shape_cast %199 : vector<64xf32> to vector<1x64xf32>
    %201 = vector.broadcast %200 : vector<1x64xf32> to vector<8x64xf32>
    %202 = arith.mulf %197, %201 : vector<8x64xf32>
    %203 = vector.extract_strided_slice %9 {offsets = [1, 0, 0], sizes = [1, 8, 64], strides = [1, 1, 1]} : vector<4x8x64xf32> to vector<1x8x64xf32>
    %204 = vector.shape_cast %203 : vector<1x8x64xf32> to vector<8x64xf32>
    %205 = vector.extract_strided_slice %6 {offsets = [1, 5, 0], sizes = [1, 1, 64], strides = [1, 1, 1]} : vector<4x8x64xf32> to vector<1x1x64xf32>
    %206 = vector.shape_cast %205 : vector<1x1x64xf32> to vector<64xf32>
    %207 = vector.shape_cast %206 : vector<64xf32> to vector<1x64xf32>
    %208 = vector.broadcast %207 : vector<1x64xf32> to vector<8x64xf32>
    %209 = arith.mulf %204, %208 : vector<8x64xf32>
    %210 = arith.addf %202, %209 : vector<8x64xf32>
    %211 = vector.extract_strided_slice %9 {offsets = [2, 0, 0], sizes = [1, 8, 64], strides = [1, 1, 1]} : vector<4x8x64xf32> to vector<1x8x64xf32>
    %212 = vector.shape_cast %211 : vector<1x8x64xf32> to vector<8x64xf32>
    %213 = vector.extract_strided_slice %6 {offsets = [2, 5, 0], sizes = [1, 1, 64], strides = [1, 1, 1]} : vector<4x8x64xf32> to vector<1x1x64xf32>
    %214 = vector.shape_cast %213 : vector<1x1x64xf32> to vector<64xf32>
    %215 = vector.shape_cast %214 : vector<64xf32> to vector<1x64xf32>
    %216 = vector.broadcast %215 : vector<1x64xf32> to vector<8x64xf32>
    %217 = arith.mulf %212, %216 : vector<8x64xf32>
    %218 = arith.addf %210, %217 : vector<8x64xf32>
    %219 = vector.extract_strided_slice %9 {offsets = [3, 0, 0], sizes = [1, 8, 64], strides = [1, 1, 1]} : vector<4x8x64xf32> to vector<1x8x64xf32>
    %220 = vector.shape_cast %219 : vector<1x8x64xf32> to vector<8x64xf32>
    %221 = vector.extract_strided_slice %6 {offsets = [3, 5, 0], sizes = [1, 1, 64], strides = [1, 1, 1]} : vector<4x8x64xf32> to vector<1x1x64xf32>
    %222 = vector.shape_cast %221 : vector<1x1x64xf32> to vector<64xf32>
    %223 = vector.shape_cast %222 : vector<64xf32> to vector<1x64xf32>
    %224 = vector.broadcast %223 : vector<1x64xf32> to vector<8x64xf32>
    %225 = arith.mulf %220, %224 : vector<8x64xf32>
    %226 = arith.addf %218, %225 : vector<8x64xf32>
    %227 = vector.extract_strided_slice %4 {offsets = [0, 320], sizes = [8, 64], strides = [1, 1]} : vector<8x512xf32> to vector<8x64xf32>
    %228 = vector.extract_strided_slice %8 {offsets = [0, 5], sizes = [8, 1], strides = [1, 1]} : vector<8x8xf32> to vector<8x1xf32>
    %229 = vector.broadcast %228 : vector<8x1xf32> to vector<8x64xf32>
    %230 = arith.addf %227, %229 : vector<8x64xf32>
    %231 = arith.mulf %230, %226 : vector<8x64xf32>
    %232 = arith.addf %195, %231 : vector<8x64xf32>
    %233 = vector.extract_strided_slice %9 {offsets = [0, 0, 0], sizes = [1, 8, 64], strides = [1, 1, 1]} : vector<4x8x64xf32> to vector<1x8x64xf32>
    %234 = vector.shape_cast %233 : vector<1x8x64xf32> to vector<8x64xf32>
    %235 = vector.extract_strided_slice %6 {offsets = [0, 6, 0], sizes = [1, 1, 64], strides = [1, 1, 1]} : vector<4x8x64xf32> to vector<1x1x64xf32>
    %236 = vector.shape_cast %235 : vector<1x1x64xf32> to vector<64xf32>
    %237 = vector.shape_cast %236 : vector<64xf32> to vector<1x64xf32>
    %238 = vector.broadcast %237 : vector<1x64xf32> to vector<8x64xf32>
    %239 = arith.mulf %234, %238 : vector<8x64xf32>
    %240 = vector.extract_strided_slice %9 {offsets = [1, 0, 0], sizes = [1, 8, 64], strides = [1, 1, 1]} : vector<4x8x64xf32> to vector<1x8x64xf32>
    %241 = vector.shape_cast %240 : vector<1x8x64xf32> to vector<8x64xf32>
    %242 = vector.extract_strided_slice %6 {offsets = [1, 6, 0], sizes = [1, 1, 64], strides = [1, 1, 1]} : vector<4x8x64xf32> to vector<1x1x64xf32>
    %243 = vector.shape_cast %242 : vector<1x1x64xf32> to vector<64xf32>
    %244 = vector.shape_cast %243 : vector<64xf32> to vector<1x64xf32>
    %245 = vector.broadcast %244 : vector<1x64xf32> to vector<8x64xf32>
    %246 = arith.mulf %241, %245 : vector<8x64xf32>
    %247 = arith.addf %239, %246 : vector<8x64xf32>
    %248 = vector.extract_strided_slice %9 {offsets = [2, 0, 0], sizes = [1, 8, 64], strides = [1, 1, 1]} : vector<4x8x64xf32> to vector<1x8x64xf32>
    %249 = vector.shape_cast %248 : vector<1x8x64xf32> to vector<8x64xf32>
    %250 = vector.extract_strided_slice %6 {offsets = [2, 6, 0], sizes = [1, 1, 64], strides = [1, 1, 1]} : vector<4x8x64xf32> to vector<1x1x64xf32>
    %251 = vector.shape_cast %250 : vector<1x1x64xf32> to vector<64xf32>
    %252 = vector.shape_cast %251 : vector<64xf32> to vector<1x64xf32>
    %253 = vector.broadcast %252 : vector<1x64xf32> to vector<8x64xf32>
    %254 = arith.mulf %249, %253 : vector<8x64xf32>
    %255 = arith.addf %247, %254 : vector<8x64xf32>
    %256 = vector.extract_strided_slice %9 {offsets = [3, 0, 0], sizes = [1, 8, 64], strides = [1, 1, 1]} : vector<4x8x64xf32> to vector<1x8x64xf32>
    %257 = vector.shape_cast %256 : vector<1x8x64xf32> to vector<8x64xf32>
    %258 = vector.extract_strided_slice %6 {offsets = [3, 6, 0], sizes = [1, 1, 64], strides = [1, 1, 1]} : vector<4x8x64xf32> to vector<1x1x64xf32>
    %259 = vector.shape_cast %258 : vector<1x1x64xf32> to vector<64xf32>
    %260 = vector.shape_cast %259 : vector<64xf32> to vector<1x64xf32>
    %261 = vector.broadcast %260 : vector<1x64xf32> to vector<8x64xf32>
    %262 = arith.mulf %257, %261 : vector<8x64xf32>
    %263 = arith.addf %255, %262 : vector<8x64xf32>
    %264 = vector.extract_strided_slice %4 {offsets = [0, 384], sizes = [8, 64], strides = [1, 1]} : vector<8x512xf32> to vector<8x64xf32>
    %265 = vector.extract_strided_slice %8 {offsets = [0, 6], sizes = [8, 1], strides = [1, 1]} : vector<8x8xf32> to vector<8x1xf32>
    %266 = vector.broadcast %265 : vector<8x1xf32> to vector<8x64xf32>
    %267 = arith.addf %264, %266 : vector<8x64xf32>
    %268 = arith.mulf %267, %263 : vector<8x64xf32>
    %269 = arith.addf %232, %268 : vector<8x64xf32>
    %270 = vector.extract_strided_slice %9 {offsets = [0, 0, 0], sizes = [1, 8, 64], strides = [1, 1, 1]} : vector<4x8x64xf32> to vector<1x8x64xf32>
    %271 = vector.shape_cast %270 : vector<1x8x64xf32> to vector<8x64xf32>
    %272 = vector.extract_strided_slice %6 {offsets = [0, 7, 0], sizes = [1, 1, 64], strides = [1, 1, 1]} : vector<4x8x64xf32> to vector<1x1x64xf32>
    %273 = vector.shape_cast %272 : vector<1x1x64xf32> to vector<64xf32>
    %274 = vector.shape_cast %273 : vector<64xf32> to vector<1x64xf32>
    %275 = vector.broadcast %274 : vector<1x64xf32> to vector<8x64xf32>
    %276 = arith.mulf %271, %275 : vector<8x64xf32>
    %277 = vector.extract_strided_slice %9 {offsets = [1, 0, 0], sizes = [1, 8, 64], strides = [1, 1, 1]} : vector<4x8x64xf32> to vector<1x8x64xf32>
    %278 = vector.shape_cast %277 : vector<1x8x64xf32> to vector<8x64xf32>
    %279 = vector.extract_strided_slice %6 {offsets = [1, 7, 0], sizes = [1, 1, 64], strides = [1, 1, 1]} : vector<4x8x64xf32> to vector<1x1x64xf32>
    %280 = vector.shape_cast %279 : vector<1x1x64xf32> to vector<64xf32>
    %281 = vector.shape_cast %280 : vector<64xf32> to vector<1x64xf32>
    %282 = vector.broadcast %281 : vector<1x64xf32> to vector<8x64xf32>
    %283 = arith.mulf %278, %282 : vector<8x64xf32>
    %284 = arith.addf %276, %283 : vector<8x64xf32>
    %285 = vector.extract_strided_slice %9 {offsets = [2, 0, 0], sizes = [1, 8, 64], strides = [1, 1, 1]} : vector<4x8x64xf32> to vector<1x8x64xf32>
    %286 = vector.shape_cast %285 : vector<1x8x64xf32> to vector<8x64xf32>
    %287 = vector.extract_strided_slice %6 {offsets = [2, 7, 0], sizes = [1, 1, 64], strides = [1, 1, 1]} : vector<4x8x64xf32> to vector<1x1x64xf32>
    %288 = vector.shape_cast %287 : vector<1x1x64xf32> to vector<64xf32>
    %289 = vector.shape_cast %288 : vector<64xf32> to vector<1x64xf32>
    %290 = vector.broadcast %289 : vector<1x64xf32> to vector<8x64xf32>
    %291 = arith.mulf %286, %290 : vector<8x64xf32>
    %292 = arith.addf %284, %291 : vector<8x64xf32>
    %293 = vector.extract_strided_slice %9 {offsets = [3, 0, 0], sizes = [1, 8, 64], strides = [1, 1, 1]} : vector<4x8x64xf32> to vector<1x8x64xf32>
    %294 = vector.shape_cast %293 : vector<1x8x64xf32> to vector<8x64xf32>
    %295 = vector.extract_strided_slice %6 {offsets = [3, 7, 0], sizes = [1, 1, 64], strides = [1, 1, 1]} : vector<4x8x64xf32> to vector<1x1x64xf32>
    %296 = vector.shape_cast %295 : vector<1x1x64xf32> to vector<64xf32>
    %297 = vector.shape_cast %296 : vector<64xf32> to vector<1x64xf32>
    %298 = vector.broadcast %297 : vector<1x64xf32> to vector<8x64xf32>
    %299 = arith.mulf %294, %298 : vector<8x64xf32>
    %300 = arith.addf %292, %299 : vector<8x64xf32>
    %301 = vector.extract_strided_slice %4 {offsets = [0, 448], sizes = [8, 64], strides = [1, 1]} : vector<8x512xf32> to vector<8x64xf32>
    %302 = vector.extract_strided_slice %8 {offsets = [0, 7], sizes = [8, 1], strides = [1, 1]} : vector<8x8xf32> to vector<8x1xf32>
    %303 = vector.broadcast %302 : vector<8x1xf32> to vector<8x64xf32>
    %304 = arith.addf %301, %303 : vector<8x64xf32>
    %305 = arith.mulf %304, %300 : vector<8x64xf32>
    %306 = arith.addf %269, %305 : vector<8x64xf32>
    %cst_16 = arith.constant dense<0.000000e+00> : vector<64xf32>
    %307 = vector.multi_reduction <add>, %306, %cst_16 [0] : vector<8x64xf32> to vector<64xf32>
    %308 = vector.shape_cast %307 : vector<64xf32> to vector<1x64xf32>
    %cst_17 = arith.constant dense<0.000000e+00> : vector<1xf32>
    %309 = vector.multi_reduction <add>, %308, %cst_17 [1] : vector<1x64xf32> to vector<1xf32>
    %310 = vector.shape_cast %309 : vector<1xf32> to vector<1x1xf32>
    %311 = vector.shape_cast %310 : vector<1x1xf32> to vector<1x1xf32>
    %312 = vector.broadcast %311 : vector<1x1xf32> to vector<8x128xf32>
    %c0_18 = arith.constant 0 : index
    %c0_19 = arith.constant 0 : index
    %c0_20 = arith.constant 0 : index
    %c0_21 = arith.constant 0 : index
    %313 = vector.load %arg7[%c0_18, %c0_19, %c0_20, %c0_21] : memref<1x1x8x128xf32, #tpu.memory_space<vmem>>, vector<1x1x8x128xf32>
    %314 = vector.shape_cast %313 : vector<1x1x8x128xf32> to vector<8x128xf32>
    %315 = vector.shape_cast %312 : vector<8x128xf32> to vector<1x1x8x128xf32>
    tpu.vector_store %arg7[%c0_18, %c0_19, %c0_20, %c0_21], %315 {strides = array<i32>} : memref<1x1x8x128xf32, #tpu.memory_space<vmem>>, vector<1x1x8x128xf32>,
    return
  }
  func.func @transform_0(%arg0: i32, %arg1: i32) -> (i32, i32, i32, i32) {
    %c0_i32 = arith.constant 0 : i32
    %c0_i32_0 = arith.constant 0 : i32
    %c0_i32_1 = arith.constant 0 : i32
    return %arg1, %c0_i32, %c0_i32_0, %arg0 : i32, i32, i32, i32
  }
  func.func @transform_1(%arg0: i32, %arg1: i32) -> (i32, i32, i32) {
    %c0_i32 = arith.constant 0 : i32
    %c0_i32_0 = arith.constant 0 : i32
    %c0_i32_1 = arith.constant 0 : i32
    return %arg1, %c0_i32, %c0_i32_0 : i32, i32, i32
  }
  func.func @transform_2(%arg0: i32, %arg1: i32) -> (i32, i32, i32) {
    %c0_i32 = arith.constant 0 : i32
    %c0_i32_0 = arith.constant 0 : i32
    %c0_i32_1 = arith.constant 0 : i32
    return %arg1, %c0_i32, %c0_i32_0 : i32, i32, i32
  }
  func.func @transform_3(%arg0: i32, %arg1: i32) -> (i32, i32, i32) {
    %c0_i32 = arith.constant 0 : i32
    %c0_i32_0 = arith.constant 0 : i32
    %c0_i32_1 = arith.constant 0 : i32
    return %arg0, %c0_i32, %c0_i32_0 : i32, i32, i32
  }
  func.func @transform_4(%arg0: i32, %arg1: i32) -> (i32, i32, i32) {
    %c0_i32 = arith.constant 0 : i32
    %c0_i32_0 = arith.constant 0 : i32
    %c0_i32_1 = arith.constant 0 : i32
    return %c0_i32, %c0_i32_0, %arg0 : i32, i32, i32
  }
  func.func @transform_5(%arg0: i32, %arg1: i32) -> (i32, i32, i32, i32) {
    %c0_i32 = arith.constant 0 : i32
    %c0_i32_0 = arith.constant 0 : i32
    %c0_i32_1 = arith.constant 0 : i32
    return %arg0, %arg1, %c0_i32, %c0_i32_0 : i32, i32, i32, i32
  }
}

</mosaic_0001>

<bundles_post_ra>
// kernel: div.13
= control target key start
LH: loop header
LB: loop body
LE: loop exit
PB: predicated region body
PF: predicated region fallthrough
CT: control target
= control target key end

     0   :  { %s43_s8 = smov 104   ;;  %vm7_vm0 = vcmask 64512   ;;  %s44_s9 = smov 112   ;;  %s64_s0 = inlined_call_operand.vmem [shape: f32[2,32], index: 0, kind: input, shape index: {}]   ;;  %s65_s1 = inlined_call_operand.vmem [shape: f32[2,4,8], index: 1, kind: output, shape index: {}]  }
   0x1   :  { %v4_v0 = vld [vmem:[%s64_s0] sm:$0x3]  ;;  %s42_s0 = smov 120  }
   0x2   :  { %5 = vst [vmem:[#allocation1] sm:$0x3] %v4_v0 }
   0x9   :  { %v9_v1 = vld [vmem:[#allocation1] sm:$0x3]  }
   0xa   :  { %v21_v2 = vld [vmem:[#allocation1] sm:$0x3]   ;;  %10 = vrot.lane.b32.xlu0 %v9_v1, %s42_s0 }
   0xb   :  { %22 = vrot.lane.b32.xlu1 %v21_v2, %s43_s8  ;;  %v6_v3 = vld [vmem:[#allocation1] sm:$0x3]  }
   0xc   :  { %v15_v4 = vld [vmem:[#allocation1] sm:$0x3]   ;;  %8 = vst.msk [vmem:[#allocation0] ss:$8 sm:$0x3] %vm7_vm0, %v6_v3  }
   0xe   :  { %16 = vrot.lane.b32.xlu0 %v15_v4, %s44_s9 }
  0x7c   :  { %v11_v5 = vpop.permute.xlu0 %10  }
  0x7d   :  { %v23_v6 = vpop.permute.xlu1 %22   ;;  %14 = vst.msk [vmem:[#allocation0 + $0x1] ss:$8 sm:$0x3] %vm7_vm0, %v11_v5  }
  0x7e   :  { %26 = vst.msk [vmem:[#allocation0 + $0x3] ss:$8 sm:$0x3] %vm7_vm0, %v23_v6  }
  0x80   :  { %v17_v7 = vpop.permute.xlu0 %16  }
  0x81   :  { %20 = vst.msk [vmem:[#allocation0 + $0x2] ss:$8 sm:$0x3] %vm7_vm0, %v17_v7  }
  0x88   :  { %v30_v8 = vld [vmem:[#allocation0] sm:$0xf]  ;;  %v34_v9 = vld [vmem:[#allocation0 + $0x8] sm:$0xf] }
  0x89   :  { %32 = vst [vmem:[%s65_s1] sm:$0xf] %v30_v8  ;;  %38 = vst [vmem:[%s65_s1 + $0x4] sm:$0xf] %v34_v9 }

// kernel: lambda_model_forward.4
= control target key start
LH: loop header
LB: loop body
LE: loop exit
PB: predicated region body
PF: predicated region fallthrough
CT: control target
= control target key end

     0   :  { %s555_s9 = smov 0   ;;  %s557_s10 = smov 0   ;;  %s624_s0 = inlined_call_operand.vmem [shape: bf16[2,32,64], index: 0, kind: input, shape index: {}]   ;;  %s625_s1 = inlined_call_operand.vmem [shape: bf16[96,32], index: 1, kind: input, shape index: {}]   ;;  %s626_s2 = inlined_call_operand.vmem [shape: f32[2,96,64], index: 2, kind: output, shape index: {}]  }
   0x1   :  { %s559_s11 = smov 0  }
   0x2 LB: > { %s24_s12 = sadd.s32 1, %s534_s10  ;;  %p434_p0 = scmp.ge.s32.totalorder %s538_s11, 1  ;;  %s538_s11 = sphi %s559_s11, %s12_s11   ;;  %s534_s10 = sphi %s557_s10, %s628_s10   ;;  %s530_s9 = sphi %s555_s9, %s627_s9  }
   0x3   : > { %p26_p1 = scmp.ge.s32.totalorder %s24_s12, 2  ;;  %p131_p2 = scmp.lt.s32.totalorder %s538_s11, 3 }
   0x5   : > { %s630_s12 = smov (%p26_p1, %s24_s12), 0  ;;  %p132_p3 = pnand %p434_p0, %p131_p2 }
   0x6   : > { %p159_p4 = scmp.lt.s32.totalorder (!%p132_p3), %s530_s9, 1  ;;  %v510_v0 = vld [vmem:[%s625_s1 + $0x10] sm:$0xff] (!%p132_p3)   ;;  %vm234_vm0 = vcmask (!%p132_p3), 261120   ;;  %v512_v1 = vld [vmem:[%s625_s1] sm:$0xff] (!%p132_p3)   ;;  %v511_v4 = vld [vmem:[%s625_s1 + $0x18] sm:$0xff] (!%p132_p3)   ;;  %vm334_vm1 = vcmask (!%p132_p3), 523264  }
   0x7   : > { %135 = sbr.rel (%p132_p3) target bundleno = 250 (0xfa), region = 28  ;;  %471 = vmatprep.mubr.msk.bf16.mxu1 (!%p132_p3), %vm234_vm0, %v510_v0  ;;  %467 = vmatprep.mubr.msk.bf16.mxu0 (!%p132_p3), %vm234_vm0, %v512_v1  ;;  %v513_v5 = vld [vmem:[%s625_s1 + $0x8] sm:$0xff] (!%p132_p3)   ;;  %v514_v6 = vld [vmem:[%s625_s1 + $0x20] sm:$0xff] (!%p132_p3)  }
   0x8   : > { %v515_v7 = vld [vmem:[%s625_s1 + $0x28] sm:$0xff] (!%p132_p3)  }
   0xe   : > { %s632_s9 = smov (!%p159_p4, %s530_s9), 1 }
   0xf   : > { %s454_s17 = sshll.u32 %s632_s9, 4  ;;  %s483_s29 = smul.u32 96, %s632_s9 }
  0x10   : > { %s166_s20 = scalar_lea.vmem %s624_s0, %s454_s17 }
  0x11   : > { %v508_v2 = vld [vmem:[%s166_s20] sm:$0xff]   ;;  %v509_v3 = vld [vmem:[%s166_s20 + $0x8] sm:$0xff]   ;;  %s174_s4 = scalar_lea.vmem %s626_s2, %s483_s29 }
  0x12   : > { %479 = vmatprep.subr.bf16.mxu1 %v508_v2  ;;  %463 = vmatprep.subr.bf16.mxu0 %v508_v2 }
  0x13   : > { %481 = vmatpush3.bf16.msra.mxu1 %v508_v2  ;;  %464 = vmatpush3.bf16.msra.mxu0 %v508_v2 }
  0x14   : > { %480 = vmatprep.subr.bf16.mxu1 %v509_v3  ;;  %465 = vmatprep.subr.bf16.mxu0 %v509_v3 }
  0x17   : > { %482 = vmatpush3.bf16.msra.mxu1 %v509_v3  ;;  %466 = vmatpush3.bf16.msra.mxu0 %v509_v3 }
  0x1a   : > { %472 = vmatmul.mubr.msk.bf16.vlgmr.msra.gmra.mrb[0].mxu1 %vm234_vm0, %v511_v4  ;;  %468 = vmatmul.mubr.msk.bf16.vlgmr.msra.gmra.mrb[0].mxu0 %vm234_vm0, %v513_v5 }
  0x1b   : > { %475 = vmatprep.mubr.msk.bf16.mxu1 %vm234_vm0, %v514_v6 }
  0x22   : > { %476 = vmatmul.mubr.msk.bf16.gmra.mrb[4].mxu1 %vm234_vm0, %v515_v7 }
  0xed   : > { %v473_v8 = vpop.f32.mrb[0].mxu1  ;;  %v469_v9 = vpop.f32.mrb[0].mxu0 }
  0xee   : > { %341 = vst.msk [vmem:[%s174_s4 + $0x30] sm:$0xff] %vm334_vm1, %v473_v8  ;;  %v303_v10 = vpop.f32.mrb[1].mxu1  ;;  %337 = vst.msk [vmem:[%s174_s4 + $0x10] sm:$0xff] %vm334_vm1, %v469_v9  ;;  %v287_v11 = vpop.f32.mrb[1].mxu0 }
  0xef   : > { %339 = vst.msk [vmem:[%s174_s4 + $0x20] sm:$0xff] %vm334_vm1, %v303_v10  ;;  %v474_v12 = vpop.f32.mrb[2].mxu1  ;;  %335 = vst.msk [vmem:[%s174_s4] sm:$0xff] %vm334_vm1, %v287_v11  ;;  %v470_v13 = vpop.f32.mrb[2].mxu0 }
  0xf0   : > { %342 = vst.msk [vmem:[%s174_s4 + $0x38] sm:$0xff] %vm334_vm1, %v474_v12  ;;  %v306_v14 = vpop.f32.mrb[3].mxu1  ;;  %338 = vst.msk [vmem:[%s174_s4 + $0x18] sm:$0xff] %vm334_vm1, %v470_v13  ;;  %v290_v15 = vpop.f32.mrb[3].mxu0 }
  0xf1   : > { %340 = vst.msk [vmem:[%s174_s4 + $0x28] sm:$0xff] %vm334_vm1, %v306_v14  ;;  %336 = vst.msk [vmem:[%s174_s4 + $0x8] sm:$0xff] %vm334_vm1, %v290_v15 }
  0xf5   : > { %v477_v16 = vpop.f32.mrb[4].mxu1 }
  0xf6   : > { %345 = vst.msk [vmem:[%s174_s4 + $0x50] sm:$0xff] %vm334_vm1, %v477_v16  ;;  %v319_v17 = vpop.f32.mrb[5].mxu1 }
  0xf7   : > { %343 = vst.msk [vmem:[%s174_s4 + $0x40] sm:$0xff] %vm334_vm1, %v319_v17  ;;  %v478_v18 = vpop.f32.mrb[6].mxu1 }
  0xf8   : > { %346 = vst.msk [vmem:[%s174_s4 + $0x58] sm:$0xff] %vm334_vm1, %v478_v18  ;;  %v322_v19 = vpop.f32.mrb[7].mxu1 }
  0xf9   : > { %344 = vst.msk [vmem:[%s174_s4 + $0x48] sm:$0xff] %vm334_vm1, %v322_v19 }
  0xfa PF: > { %s12_s11 = sadd.s32 1, %s538_s11   ;;  %s627_s9 = smov %s534_s10 }
  0xfb   : > { %p9_p5 = scmp.ge.s32.totalorder %s12_s11, 4   ;;  %s628_s10 = smov %s630_s12 }
  0xfd   :  { %11 = sbr.rel (!%p9_p5) target bundleno = 2 (0x2), region = 58 }

// kernel: lambda_model_forward.3
= control target key start
LH: loop header
LB: loop body
LE: loop exit
PB: predicated region body
PF: predicated region fallthrough
CT: control target
= control target key end

     0   :  { %8 = vsyncpa [#allocation3], 0  ;;  %s651_s0 = inlined_call_operand.vmem [shape: f32[2,3,8,64], index: 0, kind: input, shape index: {}]   ;;  %s652_s1 = inlined_call_operand.vmem [shape: f32[4,3], index: 1, kind: input, shape index: {}]   ;;  %s653_s2 = inlined_call_operand.vmem [shape: f32[4], index: 2, kind: input, shape index: {}]   ;;  %s654_s3 = inlined_call_operand.vmem [shape: bf16[2,4,8,64], index: 3, kind: output, shape index: {}]  }
   0x1   :  { %9 = vsyncpa [#allocation5], 0  ;;  %s552_s12 = smov 0  }
   0x2 LB: > { %s558_s13 = sadd.s32 4294967295, %s528_s12   ;;  %p406_p0 = scmp.ge.s32.totalorder %s528_s12, 1  ;;  %s528_s12 = sphi %s552_s12, %s15_s12  }
   0x3   : > { %p114_p1 = scmp.lt.s32.totalorder %s528_s12, 3  ;;  %s127_s16 = sshll.u32 %s652_s1, 4  ;;  %s128_s16 = int_to_ptr.vmem [resolvable:$true] %s127_s16 }
   0x4   : > { %p655_p3 = scmp.eq.s32.totalorder %s558_s13, 0  ;;  %s138_s20 = sshll.u32 %s653_s2, 4  ;;  %s139_s20 = int_to_ptr.vmem [resolvable:$true] %s138_s20 }
   0x5   : > { %p565_p2 = pnand %p406_p0, %p114_p1  ;;  %s484_s22 = scalar_lea.vmem %s128_s16, 64 }
   0x6   : > { %p485_p6 = scmp.ne.s32.totalorder %s128_s16, %s484_s22  ;;  %p492_p10 = scmp.lt.s32.totalorder %s128_s16, %s128_s16 }
   0x7   : > { %s657_s17 = scalar_select %p565_p2, 1, 0 }
   0x8   : > { %p447_p4 = pneg %p565_p2  ;;  %p493_p11 = scmp.lt.s32.totalorder %s484_s22, %s484_s22 }
   0xa   : > { %p577_p5 = pnand %p655_p3, %p447_p4  ;;  %p494_p12 = por %p493_p11, %p492_p10 }
   0xc   : > { %p486_p7 = pneg %p577_p5 }
   0xe   : > { %p487_p8 = pnand %p486_p7, %p485_p6 }
  0x10   : > { %p488_p9 = pneg %p487_p8 }
  0x12   : > { %p495_p13 = pnand %p494_p12, %p488_p9 }
  0x14   : > { %498 = shalt.err (!%p495_p13)
}
  0x15   : > { %s530_s23 = smov [#allocation2]   ;;  %s499_s24 = scalar_lea.vmem %s139_s20, 16 }
  0x16   : > { %450 = dma.vmem_to_smem (!%p577_p5), %s128_s16, 64, %s530_s23, [#allocation3]  }
  0x17   : > { %p500_p0 = scmp.ne.s32.totalorder %s139_s20, %s499_s24  ;;  %p507_p3 = scmp.lt.s32.totalorder %s139_s20, %s139_s20 }
  0x18   : > { %p508_p2 = scmp.lt.s32.totalorder %s499_s24, %s499_s24 }
  0x19   : > { %p502_p1 = pnand %p500_p0, %p486_p7 }
  0x1a   : > { %p509_p6 = por %p508_p2, %p507_p3 }
  0x1b   : > { %p503_p4 = pneg %p502_p1 }
  0x1d   : > { %p510_p8 = pnand %p509_p6, %p503_p4 }
  0x1f   : > { %513 = shalt.err (!%p510_p8)
}
  0x20   : > { %s531_s25 = smov [#allocation4]   ;;  %p659_p9 = scmp.ne.s32.totalorder %s657_s17, 0 }
  0x21   : > { %453 = dma.vmem_to_smem (!%p577_p5), %s139_s20, 16, %s531_s25, [#allocation5]  }
  0x22   : > { %159 = sbr.rel (%p659_p9) target bundleno = 106 (0x6a), region = 32  ;;  %p660_p10 = scmp.eq.s32.totalorder (!%p659_p9), %s558_s13, 0 }
  0x29   : > { %519 = dma.done.wait (%p660_p10), [#allocation3], 64   ;;  %p661_p11 = pmov %p660_p10 }
  0x2a   : > { %p662_p7 = pmov %p660_p10 }
  0x2b   : > { %521 = vsyncadd (%p661_p11), [#allocation3], 4294967232 }
  0x2c   : > { %523 = dma.done.wait (%p662_p7), [#allocation5], 16   ;;  %p663_p2 = pmov %p662_p7 }
  0x2e   : > { %525 = vsyncadd (%p663_p2), [#allocation5], 4294967280 }
  0x2f   : > { %169 = sfence }
  0x30   : > { %p188_p3 = scmp.lt.s32.totalorder %s558_s13, 1  ;;  %s203_s26 = sld [smem:[#allocation2]]  ;;  %vm232_vm2 = vcmask 519168  }
  0x31   : > { %s418_s27 = sld [smem:[#allocation2 + $0x1]]  ;;  %s419_s28 = sld [smem:[#allocation2 + $0x2]] }
  0x32   : > { %s665_s13 = smov (!%p188_p3, %s558_s13), 1  ;;  %s601_s29 = sld [smem:[#allocation4]] }
  0x33   : > { %s420_s30 = sld [smem:[#allocation2 + $0x80]]  ;;  %s438_s4 = smul.u32 24, %s665_s13 }
  0x34   : > { %s421_s5 = sld [smem:[#allocation2 + $0x81]]  ;;  %s425_s9 = sld [smem:[#allocation2 + $0x100]] }
  0x35   : > { %s192_s8 = scalar_lea.vmem %s651_s0, %s438_s4  ;;  %s426_s10 = sld [smem:[#allocation2 + $0x101]] }
  0x36   : > { %v204_v0 = vstv %s203_s26  ;;  %v198_v1 = vld [vmem:[%s192_s8] sm:$0xff]  ;;  %v416_v2 = vld [vmem:[%s192_s8 + $0x8] sm:$0xff]  ;;  %v417_v3 = vld [vmem:[%s192_s8 + $0x10] sm:$0xff]  ;;  %s430_s11 = sld [smem:[#allocation2 + $0x180]]  ;;  %s431_s14 = sld [smem:[#allocation2 + $0x181]] }
  0x37   : > { %v207_v4 = vstv %s418_s27  ;;  %v205_v5 = vmul.f32 %v204_v0, %v198_v1  ;;  %v211_v7 = vstv %s419_s28  ;;  %s422_s15 = sld [smem:[#allocation2 + $0x82]]  ;;  %s607_s16 = sld [smem:[#allocation4 + $0x1]] }
  0x38   : > { %v208_v6 = vmul.f32 %v416_v2, %v207_v4  ;;  %v212_v8 = vmul.f32 %v417_v3, %v211_v7  ;;  %s427_s17 = sld [smem:[#allocation2 + $0x102]]  ;;  %v215_v11 = vstv %s601_s29  ;;  %s433_s20 = sld [smem:[#allocation4 + $0x3]] }
  0x39   : > { %v235_v9 = vstv %s420_s30  ;;  %s610_s18 = sld [smem:[#allocation4 + $0x2]]  ;;  %s437_s21 = sshll.u32 %s665_s13, 4 }
  0x3a   : > { %v209_v10 = vadd.f32 %v208_v6, %v205_v5  ;;  %v236_v12 = vmul.f32 %v235_v9, %v198_v1  ;;  %v238_v13 = vstv %s421_s5  ;;  %s432_s19 = sld [smem:[#allocation2 + $0x182]]  ;;  %v266_v16 = vstv %s425_s9  ;;  %s631_s24 = scalar_lea.vmem %s654_s3, %s437_s21 }
  0x3b   : > { %v239_v15 = vmul.f32 %v416_v2, %v238_v13  ;;  %v267_v17 = vmul.f32 %v266_v16, %v198_v1  ;;  %v269_v18 = vstv %s426_s10 }
  0x3c   : > { %v213_v14 = vadd.f32 %v212_v8, %v209_v10  ;;  %v270_v20 = vmul.f32 %v416_v2, %v269_v18  ;;  %v297_v21 = vstv %s430_s11  ;;  %v300_v22 = vstv %s431_s14 }
  0x3d   : > { %v298_v23 = vmul.f32 %v297_v21, %v198_v1  ;;  %v301_v24 = vmul.f32 %v416_v2, %v300_v22  ;;  %v240_v25 = vadd.f32 %v239_v15, %v236_v12  ;;  %v242_v26 = vstv %s422_s15 }
  0x3e   : > { %v612_v19 = vadd.f32 %v215_v11, %v213_v14  ;;  %v243_v28 = vmul.f32 %v417_v3, %v242_v26  ;;  %v246_v29 = vstv %s607_s16  ;;  %v271_v30 = vadd.f32 %v270_v20, %v267_v17 }
  0x3f   : > { %v273_v31 = vstv %s427_s17  ;;  %v302_v32 = vadd.f32 %v301_v24, %v298_v23  ;;  %v277_v37 = vstv %s610_s18  ;;  %v308_v41 = vstv %s433_s20 }
  0x40   : > { %v218_v27 = vmin.f32 %v612_v19, 20.0  ;;  %v244_v34 = vadd.f32 %v243_v28, %v240_v25  ;;  %v274_v35 = vmul.f32 %v417_v3, %v273_v31  ;;  %v304_v36 = vstv %s432_s19 }
  0x41   : > { %v305_v38 = vmul.f32 %v417_v3, %v304_v36  ;;  %vm217_vm1 = vcmp.gt.f32.partialorder %v612_v19, 20.0 }
  0x42   : > { %v219_v33 = vmul.f32 1.442695, %v218_v27  ;;  %v617_v39 = vadd.f32 %v246_v29, %v244_v34  ;;  %v275_v40 = vadd.f32 %v274_v35, %v271_v30 }
  0x43   : > { %v306_v42 = vadd.f32 %v305_v38, %v302_v32 }
  0x44   : > { %468 = vpow2.f32 %v219_v33  ;;  %v249_v43 = vmin.f32 %v617_v39, 20.0  ;;  %v620_v44 = vadd.f32 %v277_v37, %v275_v40  ;;  %vm248_vm4 = vcmp.gt.f32.partialorder %v617_v39, 20.0 }
  0x45   : > { %v622_v45 = vadd.f32 %v308_v41, %v306_v42 }
  0x46   : > { %v250_v46 = vmul.f32 1.442695, %v249_v43  ;;  %v280_v47 = vmin.f32 %v620_v44, 20.0  ;;  %vm279_vm6 = vcmp.gt.f32.partialorder %v620_v44, 20.0 }
  0x47   : > { %v311_v48 = vmin.f32 %v622_v45, 20.0  ;;  %vm310_vm8 = vcmp.gt.f32.partialorder %v622_v45, 20.0 }
  0x48   : > { %470 = vpow2.f32 %v250_v46  ;;  %v281_v49 = vmul.f32 1.442695, %v280_v47 }
  0x49   : > { %v312_v50 = vmul.f32 1.442695, %v311_v48 }
  0x4a   : > { %472 = vpow2.f32 %v281_v49 }
  0x4b   : > { %474 = vpow2.f32 %v312_v50 }
  0x4e   : > { %v469_v51 = vpop.eup %468 }
  0x4f   : > { %v221_v52 = vadd.f32 1.0, %v469_v51  ;;  %v224_v53 = vmul.f32 -0.5, %v469_v51  ;;  %v227_v59 = vand.u32 2147483647, %v469_v51 }
  0x51   : > { %476 = vlog2.f32 %v221_v52  ;;  %v225_v57 = vadd.f32 1.0, %v224_v53  ;;  %vm228_vm0 = vcmp.lt.f32.partialorder %v227_v59, 0.0004427343 }
  0x52   : > { %v471_v54 = vpop.eup %470 }
  0x53   : > { %v252_v55 = vadd.f32 1.0, %v471_v54  ;;  %v255_v61 = vmul.f32 -0.5, %v471_v54  ;;  %v226_v63 = vmul.f32 %v469_v51, %v225_v57  ;;  %v258_v5 = vand.u32 2147483647, %v471_v54 }
  0x54   : > { %v473_v56 = vpop.eup %472 }
  0x55   : > { %v475_v58 = vpop.eup %474  ;;  %478 = vlog2.f32 %v252_v55  ;;  %v283_v60 = vadd.f32 1.0, %v473_v56  ;;  %v286_v0 = vmul.f32 -0.5, %v473_v56  ;;  %v256_v4 = vadd.f32 1.0, %v255_v61 }
  0x56   : > { %v314_v62 = vadd.f32 1.0, %v475_v58  ;;  %v317_v2 = vmul.f32 -0.5, %v475_v58  ;;  %v289_v9 = vand.u32 2147483647, %v473_v56  ;;  %v320_v13 = vand.u32 2147483647, %v475_v58 }
  0x57   : > { %480 = vlog2.f32 %v283_v60  ;;  %v287_v7 = vadd.f32 1.0, %v286_v0  ;;  %v257_v12 = vmul.f32 %v471_v54, %v256_v4  ;;  %vm259_vm3 = vcmp.lt.f32.partialorder %v258_v5, 0.0004427343 }
  0x58   : > { %482 = vlog2.f32 %v314_v62  ;;  %v318_v10 = vadd.f32 1.0, %v317_v2  ;;  %vm290_vm5 = vcmp.lt.f32.partialorder %v289_v9, 0.0004427343  ;;  %vm321_vm7 = vcmp.lt.f32.partialorder %v320_v13, 0.0004427343 }
  0x59   : > { %v288_v16 = vmul.f32 %v473_v56, %v287_v7 }
  0x5a   : > { %v319_v18 = vmul.f32 %v475_v58, %v318_v10 }
  0x5b   : > { %v477_v1 = vpop.eup %476 }
  0x5c   : > { %v223_v3 = vmul.f32 0.6931472, %v477_v1 }
  0x5e   : > { %v229_v6 = vsel %vm228_vm0, %v226_v63, %v223_v3 }
  0x5f   : > { %v230_v8 = vsel %vm217_vm1, %v612_v19, %v229_v6  ;;  %v479_v14 = vpop.eup %478 }
  0x60   : > { %v231_v11 = vpack.c.bf16 %v230_v8, %v230_v8  ;;  %v254_v15 = vmul.f32 0.6931472, %v479_v14 }
  0x61   : > { %v481_v17 = vpop.eup %480 }
  0x62   : > { %233 = vst.msk [vmem:[%s631_s24] sm:$0xf] %vm232_vm2, %v231_v11  ;;  %v483_v20 = vpop.eup %482  ;;  %v260_v19 = vsel %vm259_vm3, %v257_v12, %v254_v15  ;;  %v285_v21 = vmul.f32 0.6931472, %v481_v17 }
  0x63   : > { %v261_v22 = vsel %vm248_vm4, %v617_v39, %v260_v19  ;;  %v316_v23 = vmul.f32 0.6931472, %v483_v20 }
  0x64   : > { %v262_v24 = vpack.c.bf16 %v261_v22, %v261_v22  ;;  %v291_v25 = vsel %vm290_vm5, %v288_v16, %v285_v21 }
  0x65   : > { %v292_v26 = vsel %vm279_vm6, %v620_v44, %v291_v25  ;;  %v322_v27 = vsel %vm321_vm7, %v319_v18, %v316_v23 }
  0x66   : > { %424 = vst.msk [vmem:[%s631_s24 + $0x4] sm:$0xf] %vm232_vm2, %v262_v24  ;;  %v293_v28 = vpack.c.bf16 %v292_v26, %v292_v26  ;;  %v323_v29 = vsel %vm310_vm8, %v622_v45, %v322_v27 }
  0x67   : > { %v324_v30 = vpack.c.bf16 %v323_v29, %v323_v29 }
  0x68   : > { %429 = vst.msk [vmem:[%s631_s24 + $0x8] sm:$0xf] %vm232_vm2, %v293_v28 }
  0x69   : > { %434 = vst.msk [vmem:[%s631_s24 + $0xc] sm:$0xf] %vm232_vm2, %v324_v30 }
  0x6a PF: > { %s15_s12 = sadd.s32 1, %s528_s12  }
  0x6b   : > { %p12_p5 = scmp.ge.s32.totalorder %s15_s12, 4  }
  0x6d   :  { %14 = sbr.rel (!%p12_p5) target bundleno = 2 (0x2), region = 76 }
  0x74   :  { %348 = vsyncpa [#allocation3], 1 }
  0x75   :  { %350 = vsyncpa [#allocation3 + $0x1], 1 }
  0x76   :  { %351 = vsyncpa [#allocation5], 1 }

// kernel: lambda_model_forward.5
= control target key start
LH: loop header
LB: loop body
LE: loop exit
PB: predicated region body
PF: predicated region fallthrough
CT: control target
= control target key end

     0   :  { %s1522_s18 = smov 0   ;;  %s1524_s19 = smov 0   ;;  %s1902_s0 = inlined_call_operand.vmem [shape: f32[2,4,8,64], index: 0, kind: input, shape index: {}]   ;;  %s1903_s1 = inlined_call_operand.vmem [shape: bf16[2,8,256], index: 1, kind: input, shape index: {}]   ;;  %s1904_s2 = inlined_call_operand.vmem [shape: f32[2,8,8], index: 2, kind: input, shape index: {}]   ;;  %s1905_s3 = inlined_call_operand.vmem [shape: bf16[1,256,512], index: 3, kind: input, shape index: {}]   ;;  %s1906_s4 = inlined_call_operand.vmem [shape: f32[4,8,64], index: 4, kind: input, shape index: {}]   ;;  %s1907_s5 = inlined_call_operand.vmem [shape: f32[1,2,8,128], index: 5, kind: output, shape index: {}]  }
   0x1   :  { %s1526_s20 = smov 0  }
   0x2 LB: > { %s24_s21 = sadd.s32 1, %s1477_s19  ;;  %p1242_p0 = scmp.ge.s32.totalorder %s1481_s20, 1  ;;  %s1481_s20 = sphi %s1526_s20, %s15_s20   ;;  %s1477_s19 = sphi %s1524_s19, %s1909_s19   ;;  %s1473_s18 = sphi %s1522_s18, %s1908_s18  }
   0x3   : > { %p25_p1 = scmp.ge.s32.totalorder %s24_s21, 2  ;;  %p244_p2 = scmp.lt.s32.totalorder %s1481_s20, 3 }
   0x5   : > { %s1911_s21 = smov (%p25_p1, %s24_s21), 0  ;;  %p245_p3 = pnand %p1242_p0, %p244_p2 }
   0x6   : > { %v1361_v0 = vld [vmem:[%s1905_s3 + $0x4] ss:$16 sps:$4 sm:$0xff] (!%p245_p3)   ;;  %v1363_v1 = vld [vmem:[%s1905_s3 + $0xc] ss:$16 sps:$4 sm:$0xff] (!%p245_p3)   ;;  %v1483_v2 = vmov (!%p245_p3), 5   ;;  %v1484_v5 = vmov (!%p245_p3), 1   ;;  %v813_v38 = vlaneseq (!%p245_p3) }
   0x7   : > { %248 = sbr.rel (%p245_p3) target bundleno = 574 (0x23e), region = 40  ;;  %1354 = vset.pattern.permute.xlu1 (!%p245_p3), %v1483_v2  ;;  %722 = vmatprep.subr.bf16.mxu0 (!%p245_p3), %v1361_v0  ;;  %v1365_v3 = vld [vmem:[%s1905_s3] ss:$16 sps:$4 sm:$0xff] (!%p245_p3)   ;;  %v1366_v4 = vld [vmem:[%s1905_s3 + $0x8] ss:$16 sps:$4 sm:$0xff] (!%p245_p3)   ;;  %p296_p4 = scmp.lt.s32.totalorder (!%p245_p3), %s1473_s18, 1 }
   0x8   : > { %1352 = vset.pattern.permute.xlu0 (!%p245_p3), %v1484_v5  ;;  %763 = vmatprep.subr.bf16.mxu1 (!%p245_p3), %v1363_v1  ;;  %v1367_v6 = vld [vmem:[%s1905_s3 + $0x24] ss:$16 sps:$4 sm:$0xff] (!%p245_p3)   ;;  %v1369_v7 = vld [vmem:[%s1905_s3 + $0x2c] ss:$16 sps:$4 sm:$0xff] (!%p245_p3)   ;;  %v1371_v8 = vld [vmem:[%s1905_s3 + $0x20] ss:$16 sps:$4 sm:$0xff] (!%p245_p3)  }
   0x9   : > { %723 = vmatpush1.bf16.msra.mxu0 (!%p245_p3), %v1365_v3  ;;  %764 = vmatpush1.bf16.msra.mxu1 (!%p245_p3), %v1366_v4  ;;  %v1372_v9 = vld [vmem:[%s1905_s3 + $0x28] ss:$16 sps:$4 sm:$0xff] (!%p245_p3)   ;;  %v1373_v10 = vld [vmem:[%s1905_s3 + $0x44] ss:$16 sps:$4 sm:$0xff] (!%p245_p3)   ;;  %v1375_v11 = vld [vmem:[%s1905_s3 + $0x4c] ss:$16 sps:$4 sm:$0xff] (!%p245_p3)  }
   0xa   : > { %724 = vmatprep.subr.bf16.mxu0 (!%p245_p3), %v1367_v6  ;;  %765 = vmatprep.subr.bf16.mxu1 (!%p245_p3), %v1369_v7  ;;  %v1377_v12 = vld [vmem:[%s1905_s3 + $0x40] ss:$16 sps:$4 sm:$0xff] (!%p245_p3)   ;;  %v1378_v13 = vld [vmem:[%s1905_s3 + $0x48] ss:$16 sps:$4 sm:$0xff] (!%p245_p3)   ;;  %v1379_v14 = vld [vmem:[%s1905_s3 + $0x64] ss:$16 sps:$4 sm:$0xff] (!%p245_p3)  }
   0xb   : > { %v1381_v15 = vld [vmem:[%s1905_s3 + $0x6c] ss:$16 sps:$4 sm:$0xff] (!%p245_p3)   ;;  %v1383_v16 = vld [vmem:[%s1905_s3 + $0x60] ss:$16 sps:$4 sm:$0xff] (!%p245_p3)   ;;  %v1384_v17 = vld [vmem:[%s1905_s3 + $0x68] ss:$16 sps:$4 sm:$0xff] (!%p245_p3)  }
   0xc   : > { %v1385_v18 = vld [vmem:[%s1905_s3 + $0x84] ss:$16 sps:$4 sm:$0xff] (!%p245_p3)   ;;  %v1387_v19 = vld [vmem:[%s1905_s3 + $0x8c] ss:$16 sps:$4 sm:$0xff] (!%p245_p3)   ;;  %v1389_v20 = vld [vmem:[%s1905_s3 + $0x80] ss:$16 sps:$4 sm:$0xff] (!%p245_p3)  }
   0xd   : > { %725 = vmatpush1.bf16.msra.mxu0 (!%p245_p3), %v1371_v8  ;;  %766 = vmatpush1.bf16.msra.mxu1 (!%p245_p3), %v1372_v9  ;;  %v1390_v21 = vld [vmem:[%s1905_s3 + $0x88] ss:$16 sps:$4 sm:$0xff] (!%p245_p3)   ;;  %v1391_v22 = vld [vmem:[%s1905_s3 + $0xa4] ss:$16 sps:$4 sm:$0xff] (!%p245_p3)   ;;  %v1393_v23 = vld [vmem:[%s1905_s3 + $0xac] ss:$16 sps:$4 sm:$0xff] (!%p245_p3)  }
   0xe   : > { %726 = vmatprep.subr.bf16.mxu0 %v1373_v10  ;;  %767 = vmatprep.subr.bf16.mxu1 %v1375_v11  ;;  %v1395_v24 = vld [vmem:[%s1905_s3 + $0xa0] ss:$16 sps:$4 sm:$0xff]   ;;  %v1396_v25 = vld [vmem:[%s1905_s3 + $0xa8] ss:$16 sps:$4 sm:$0xff]   ;;  %v1397_v26 = vld [vmem:[%s1905_s3 + $0xc4] ss:$16 sps:$4 sm:$0xff]  }
   0xf   : > { %v1399_v27 = vld [vmem:[%s1905_s3 + $0xcc] ss:$16 sps:$4 sm:$0xff]   ;;  %v1401_v28 = vld [vmem:[%s1905_s3 + $0xc0] ss:$16 sps:$4 sm:$0xff]   ;;  %v1402_v29 = vld [vmem:[%s1905_s3 + $0xc8] ss:$16 sps:$4 sm:$0xff]  }
  0x10   : > { %v1403_v30 = vld [vmem:[%s1905_s3 + $0xe4] ss:$16 sps:$4 sm:$0xff]   ;;  %v1405_v31 = vld [vmem:[%s1905_s3 + $0xec] ss:$16 sps:$4 sm:$0xff]   ;;  %v1407_v32 = vld [vmem:[%s1905_s3 + $0xe0] ss:$16 sps:$4 sm:$0xff]  }
  0x11   : > { %727 = vmatpush1.bf16.msra.mxu0 %v1377_v12  ;;  %768 = vmatpush1.bf16.msra.mxu1 %v1378_v13  ;;  %v1408_v33 = vld [vmem:[%s1905_s3 + $0xe8] ss:$16 sps:$4 sm:$0xff]   ;;  %v1409_v34 = vld [vmem:[%s1905_s3 + $0x104] ss:$16 sps:$4 sm:$0xff]   ;;  %v1411_v35 = vld [vmem:[%s1905_s3 + $0x10c] ss:$16 sps:$4 sm:$0xff]  }
  0x12   : > { %728 = vmatprep.subr.bf16.mxu0 %v1379_v14  ;;  %769 = vmatprep.subr.bf16.mxu1 %v1381_v15  ;;  %v1413_v36 = vld [vmem:[%s1905_s3 + $0x100] ss:$16 sps:$4 sm:$0xff]   ;;  %v1414_v37 = vld [vmem:[%s1905_s3 + $0x108] ss:$16 sps:$4 sm:$0xff]   ;;  %v1415_v39 = vld [vmem:[%s1905_s3 + $0x124] ss:$16 sps:$4 sm:$0xff]  }
  0x13   : > { %s1913_s18 = smov (!%p296_p4, %s1473_s18), 1  ;;  %v1417_v40 = vld [vmem:[%s1905_s3 + $0x12c] ss:$16 sps:$4 sm:$0xff]   ;;  %v1419_v41 = vld [vmem:[%s1905_s3 + $0x120] ss:$16 sps:$4 sm:$0xff]   ;;  %v1661_v42 = vshrl.u32 %v813_v38, 7 }
  0x14   : > { %v1420_v43 = vld [vmem:[%s1905_s3 + $0x128] ss:$16 sps:$4 sm:$0xff]   ;;  %v1421_v44 = vld [vmem:[%s1905_s3 + $0x144] ss:$16 sps:$4 sm:$0xff]   ;;  %s1669_s16 = sshll.u32 %s1913_s18, 3  ;;  %s1317_s23 = sshll.u32 %s1913_s18, 5 }
  0x15   : > { %729 = vmatpush1.bf16.msra.mxu0 %v1383_v16  ;;  %770 = vmatpush1.bf16.msra.mxu1 %v1384_v17  ;;  %v1423_v45 = vld [vmem:[%s1905_s3 + $0x14c] ss:$16 sps:$4 sm:$0xff]   ;;  %v1425_v46 = vld [vmem:[%s1905_s3 + $0x140] ss:$16 sps:$4 sm:$0xff]   ;;  %v1426_v47 = vld [vmem:[%s1905_s3 + $0x148] ss:$16 sps:$4 sm:$0xff]   ;;  %s308_s30 = scalar_lea.vmem %s1903_s1, %s1669_s16  ;;  %s303_s9 = scalar_lea.vmem %s1902_s0, %s1317_s23 }
  0x16   : > { %730 = vmatprep.subr.bf16.mxu0 %v1385_v18  ;;  %771 = vmatprep.subr.bf16.mxu1 %v1387_v19  ;;  %v1427_v48 = vld [vmem:[%s1905_s3 + $0x164] ss:$16 sps:$4 sm:$0xff]   ;;  %v846_v49 = vsub.s32 1, %v1661_v42  ;;  %v1429_v50 = vld [vmem:[%s1905_s3 + $0x16c] ss:$16 sps:$4 sm:$0xff]   ;;  %s312_s14 = scalar_lea.vmem %s1904_s2, %s1669_s16  ;;  %v914_v51 = vsub.s32 3, %v1661_v42  ;;  %s329_s25 = scalar_lea.vmem %s1907_s5, %s1669_s16 }
  0x17   : > { %v1431_v52 = vld [vmem:[%s1905_s3 + $0x160] ss:$16 sps:$4 sm:$0xff]   ;;  %v1432_v53 = vld [vmem:[%s1905_s3 + $0x168] ss:$16 sps:$4 sm:$0xff]   ;;  %v1433_v55 = vld [vmem:[%s1905_s3 + $0x184] ss:$16 sps:$4 sm:$0xff]  }
  0x18   : > { %v1705_v54 = vld [vmem:[%s308_s30] sm:$0xff]  ;;  %v1435_v56 = vld [vmem:[%s1905_s3 + $0x18c] ss:$16 sps:$4 sm:$0xff]   ;;  %v1719_v60 = vld [vmem:[%s303_s9 + $0x10] sm:$0xff]  ;;  %v982_v9 = vsub.s32 5, %v1661_v42  ;;  %s1487_s6 = smov 64  }
  0x19   : > { %731 = vmatpush1.bf16.msra.mxu0 %v1389_v20  ;;  %772 = vmatpush1.bf16.msra.mxu1 %v1390_v21  ;;  %v1250_v57 = vcombine.high %v1705_v54, %v1705_v54  ;;  %v1715_v58 = vld [vmem:[%s303_s9] sm:$0xff]  ;;  %v1717_v59 = vld [vmem:[%s303_s9 + $0x8] sm:$0xff]  ;;  %v1721_v61 = vld [vmem:[%s303_s9 + $0x18] sm:$0xff]  ;;  %v858_v2 = vrot.slane %v1719_v60, %v846_v49  ;;  %v926_v19 = vrot.slane %v1719_v60, %v914_v51  ;;  %vm1086_vm0 = vcmask 523264  }
  0x1a   : > { %732 = vmatprep.subr.bf16.mxu0 %v1391_v22  ;;  %773 = vmatprep.subr.bf16.mxu1 %v1393_v23  ;;  %v1723_v62 = vld [vmem:[%s312_s14] sm:$0xff]  ;;  %v847_v0 = vrot.slane %v1715_v58, %v846_v49  ;;  %v852_v1 = vrot.slane %v1717_v59, %v846_v49  ;;  %v1736_v3 = vld [vmem:[%s1906_s4 + $0x8] sm:$0xff]  ;;  %v1741_v4 = vld [vmem:[%s1906_s4 + $0x10] sm:$0xff]  ;;  %v864_v6 = vrot.slane %v1721_v61, %v846_v49 }
  0x1b   : > { %v1728_v63 = vld [vmem:[%s1906_s4] sm:$0xff]  ;;  %v1746_v5 = vld [vmem:[%s1906_s4 + $0x18] sm:$0xff]  ;;  %v915_v7 = vrot.slane %v1715_v58, %v914_v51  ;;  %v920_v8 = vrot.slane %v1717_v59, %v914_v51  ;;  %754 = vmatprep.mubr.bf16.mxu0 %v1250_v57  ;;  %795 = vmatprep.mubr.bf16.mxu1 %v1250_v57  ;;  %v859_v12 = vmul.f32 %v858_v2, %v1741_v4 }
  0x1c   : > { %v848_v10 = vmul.f32 %v847_v0, %v1728_v63  ;;  %v853_v11 = vmul.f32 %v852_v1, %v1736_v3  ;;  %1004 = vperm.xlu1 %1354, %v1723_v62   ;;  %868 = vperm.xlu0 %1352, %v1723_v62   ;;  %v865_v13 = vmul.f32 %v864_v6, %v1746_v5  ;;  %v1437_v16 = vld [vmem:[%s1905_s3 + $0x180] ss:$16 sps:$4 sm:$0xff]   ;;  %v1438_v17 = vld [vmem:[%s1905_s3 + $0x188] ss:$16 sps:$4 sm:$0xff]   ;;  %v1439_v21 = vld [vmem:[%s1905_s3 + $0x1a4] ss:$16 sps:$4 sm:$0xff]  }
  0x1d   : > { %733 = vmatpush1.bf16.msra.mxu0 %v1395_v24  ;;  %774 = vmatpush1.bf16.msra.mxu1 %v1396_v25  ;;  %v916_v14 = vmul.f32 %v915_v7, %v1728_v63  ;;  %v921_v15 = vmul.f32 %v920_v8, %v1736_v3  ;;  %v932_v20 = vrot.slane %v1721_v61, %v914_v51  ;;  %v1441_v22 = vld [vmem:[%s1905_s3 + $0x1ac] ss:$16 sps:$4 sm:$0xff]   ;;  %v1451_v0 = vld [vmem:[%s1905_s3 + $0x1e4] ss:$16 sps:$4 sm:$0xff]   ;;  %v1488_v8 = vmov 2  }
  0x1e   : > { %734 = vmatprep.subr.bf16.mxu0 %v1397_v26  ;;  %775 = vmatprep.subr.bf16.mxu1 %v1399_v27  ;;  %v854_v18 = vadd.f32 %v853_v11, %v848_v10  ;;  %v983_v24 = vrot.slane %v1715_v58, %v982_v9  ;;  %v988_v25 = vrot.slane %v1717_v59, %v982_v9  ;;  %v1050_v26 = vsub.s32 7, %v1661_v42  ;;  %v1453_v1 = vld [vmem:[%s1905_s3 + $0x1ec] ss:$16 sps:$4 sm:$0xff]   ;;  %v1456_v10 = vld [vmem:[%s1905_s3 + $0x1e8] ss:$16 sps:$4 sm:$0xff]  }
  0x1f   : > { %v922_v23 = vadd.f32 %v921_v15, %v916_v14  ;;  %v1489_v14 = vmov 0   ;;  %v1490_v15 = vmov 4  }
  0x20   : > { %v860_v27 = vadd.f32 %v859_v12, %v854_v18  ;;  %v1062_v49 = vrot.slane %v1719_v60, %v1050_v26 }
  0x21   : > { %735 = vmatpush1.bf16.msra.mxu0 %v1401_v28  ;;  %776 = vmatpush1.bf16.msra.mxu1 %v1402_v29  ;;  %v927_v28 = vmul.f32 %v926_v19, %v1741_v4  ;;  %v933_v29 = vmul.f32 %v932_v20, %v1746_v5 }
  0x22   : > { %736 = vmatprep.subr.bf16.mxu0 %v1403_v30  ;;  %777 = vmatprep.subr.bf16.mxu1 %v1405_v31  ;;  %v994_v30 = vrot.slane %v1719_v60, %v982_v9  ;;  %v1485_v31 = vmov 3   ;;  %v866_v38 = vadd.f32 %v865_v13, %v860_v27  ;;  %v1063_v57 = vmul.f32 %v1062_v49, %v1741_v4 }
  0x23   : > { %1353 = vset.pattern.permute.xlu0 %v1485_v31  ;;  %v1249_v13 = vcombine.low %v1705_v54, %v1705_v54 }
  0x24   : > { %873 = vrot.lane.b32.xlu1 %v866_v38, %s1487_s6  ;;  %936 = vperm.xlu0 %1353, %v1723_v62  }
  0x25   : > { %737 = vmatpush1.bf16.msra.mxu0 %v1407_v32  ;;  %778 = vmatpush1.bf16.msra.mxu1 %v1408_v33  ;;  %v1486_v32 = vmov 7   ;;  %v984_v33 = vmul.f32 %v983_v24, %v1728_v63 }
  0x26   : > { %738 = vmatprep.subr.bf16.mxu0 %v1409_v34  ;;  %779 = vmatprep.subr.bf16.mxu1 %v1411_v35  ;;  %v989_v34 = vmul.f32 %v988_v25, %v1736_v3  ;;  %v1000_v35 = vrot.slane %v1721_v61, %v982_v9  ;;  %v1455_v9 = vld [vmem:[%s1905_s3 + $0x1e0] ss:$16 sps:$4 sm:$0xff]  }
  0x27   : > { %1355 = vset.pattern.permute.xlu1 %v1486_v32 }
  0x28   : > { %1072 = vperm.xlu1 %1355, %v1723_v62   ;;  %1357 = vset.pattern.permute.xlu0 %v1488_v8 }
  0x29   : > { %739 = vmatpush1.bf16.msra.mxu0 %v1413_v36  ;;  %780 = vmatpush1.bf16.msra.mxu1 %v1414_v37  ;;  %v1443_v36 = vld [vmem:[%s1905_s3 + $0x1a0] ss:$16 sps:$4 sm:$0xff]   ;;  %v1444_v37 = vld [vmem:[%s1905_s3 + $0x1a8] ss:$16 sps:$4 sm:$0xff]  }
  0x2a   : > { %740 = vmatprep.subr.bf16.mxu0 %v1415_v39  ;;  %781 = vmatprep.subr.bf16.mxu1 %v1417_v40  ;;  %v928_v39 = vadd.f32 %v927_v28, %v922_v23  ;;  %v995_v40 = vmul.f32 %v994_v30, %v1741_v4 }
  0x2c   : > { %1356 = vset.pattern.permute.xlu1 %v1489_v14 }
  0x2d   : > { %741 = vmatpush1.bf16.msra.mxu0 %v1419_v41  ;;  %782 = vmatpush1.bf16.msra.mxu1 %v1420_v43  ;;  %v1445_v41 = vld [vmem:[%s1905_s3 + $0x1c4] ss:$16 sps:$4 sm:$0xff]   ;;  %v1447_v43 = vld [vmem:[%s1905_s3 + $0x1cc] ss:$16 sps:$4 sm:$0xff]  }
  0x2e   : > { %742 = vmatprep.subr.bf16.mxu0 %v1421_v44  ;;  %783 = vmatprep.subr.bf16.mxu1 %v1423_v45  ;;  %v990_v44 = vadd.f32 %v989_v34, %v984_v33  ;;  %v1001_v45 = vmul.f32 %v1000_v35, %v1746_v5 }
  0x31   : > { %743 = vmatpush1.bf16.msra.mxu0 %v1425_v46  ;;  %784 = vmatpush1.bf16.msra.mxu1 %v1426_v47  ;;  %v1051_v46 = vrot.slane %v1715_v58, %v1050_v26  ;;  %v934_v47 = vadd.f32 %v933_v29, %v928_v39  ;;  %v815_v39 = vsub.s32 0, %v1661_v42 }
  0x32   : > { %744 = vmatprep.subr.bf16.mxu0 %v1427_v48  ;;  %785 = vmatprep.subr.bf16.mxu1 %v1429_v50  ;;  %v1056_v48 = vrot.slane %v1717_v59, %v1050_v26  ;;  %v996_v50 = vadd.f32 %v995_v40, %v990_v44  ;;  %v884_v40 = vsub.s32 2, %v1661_v42 }
  0x33   : > { %v1052_v51 = vmul.f32 %v1051_v46, %v1728_v63  ;;  %941 = vrot.lane.b32.xlu0 %v934_v47, %s1487_s6  ;;  %v952_v46 = vsub.s32 4, %v1661_v42 }
  0x34   : > { %v1002_v2 = vadd.f32 %v1001_v45, %v996_v50  ;;  %v890_v44 = vrot.slane %v1717_v59, %v884_v40  ;;  %v885_v45 = vrot.slane %v1715_v58, %v884_v40  ;;  %v896_v50 = vrot.slane %v1719_v60, %v884_v40 }
  0x35   : > { %745 = vmatpush1.bf16.msra.mxu0 %v1431_v52  ;;  %786 = vmatpush1.bf16.msra.mxu1 %v1432_v53  ;;  %v1068_v52 = vrot.slane %v1721_v61, %v1050_v26  ;;  %v1449_v53 = vld [vmem:[%s1905_s3 + $0x1c0] ss:$16 sps:$4 sm:$0xff]  }
  0x36   : > { %746 = vmatprep.subr.bf16.mxu0 %v1433_v55  ;;  %787 = vmatprep.subr.bf16.mxu1 %v1435_v56  ;;  %v1450_v55 = vld [vmem:[%s1905_s3 + $0x1c8] ss:$16 sps:$4 sm:$0xff]   ;;  %v1057_v56 = vmul.f32 %v1056_v48, %v1736_v3  ;;  %v827_v48 = vrot.slane %v1719_v60, %v815_v39 }
  0x37   : > { %v1069_v7 = vmul.f32 %v1068_v52, %v1746_v5  ;;  %1009 = vrot.lane.b32.xlu1 %v1002_v2, %s1487_s6  ;;  %v891_v52 = vmul.f32 %v890_v44, %v1736_v3 }
  0x38   : > { %v1058_v6 = vadd.f32 %v1057_v56, %v1052_v51  ;;  %v1020_v51 = vsub.s32 6, %v1661_v42  ;;  %v958_v56 = vrot.slane %v1717_v59, %v952_v46 }
  0x39   : > { %747 = vmatpush1.bf16.msra.mxu0 %v1437_v16  ;;  %788 = vmatpush1.bf16.msra.mxu1 %v1438_v17  ;;  %v1491_v16 = vmov 6  }
  0x3a   : > { %748 = vmatprep.subr.bf16.mxu0 %v1439_v21  ;;  %789 = vmatprep.subr.bf16.mxu1 %v1441_v22  ;;  %v1064_v11 = vadd.f32 %v1063_v57, %v1058_v6  ;;  %v828_v57 = vmul.f32 %v827_v48, %v1741_v4  ;;  %v897_v6 = vmul.f32 %v896_v50, %v1741_v4 }
  0x3b   : > { %838 = vperm.xlu1 %1356, %v1723_v62   ;;  %v1021_v42 = vrot.slane %v1715_v58, %v1020_v51  ;;  %v1026_v8 = vrot.slane %v1717_v59, %v1020_v51 }
  0x3c   : > { %v1070_v12 = vadd.f32 %v1069_v7, %v1064_v11  ;;  %v902_v7 = vrot.slane %v1721_v61, %v884_v40  ;;  %v959_v11 = vmul.f32 %v958_v56, %v1736_v3 }
  0x3d   : > { %749 = vmatpush1.bf16.msra.mxu0 %v1443_v36  ;;  %790 = vmatpush1.bf16.msra.mxu1 %v1444_v37 }
  0x3e   : > { %750 = vmatprep.subr.bf16.mxu0 %v1445_v41  ;;  %791 = vmatprep.subr.bf16.mxu1 %v1447_v43  ;;  %v821_v41 = vrot.slane %v1717_v59, %v815_v39  ;;  %v816_v43 = vrot.slane %v1715_v58, %v815_v39 }
  0x3f   : > { %1077 = vrot.lane.b32.xlu0 %v1070_v12, %s1487_s6  ;;  %1358 = vset.pattern.permute.xlu1 %v1490_v15  ;;  %v964_v12 = vrot.slane %v1719_v60, %v952_v46  ;;  %v903_v15 = vmul.f32 %v902_v7, %v1746_v5 }
  0x40   : > { %974 = vperm.xlu1 %1358, %v1723_v62   ;;  %v822_v47 = vmul.f32 %v821_v41, %v1736_v3  ;;  %v817_v49 = vmul.f32 %v816_v43, %v1728_v63 }
  0x41   : > { %751 = vmatpush1.bf16.msra.mxu0 %v1449_v53  ;;  %792 = vmatpush1.bf16.msra.mxu1 %v1450_v55  ;;  %v886_v53 = vmul.f32 %v885_v45, %v1728_v63  ;;  %v953_v55 = vrot.slane %v1715_v58, %v952_v46  ;;  %v1032_v58 = vrot.slane %v1719_v60, %v1020_v51 }
  0x42   : > { %752 = vmatprep.subr.bf16.mxu0 %v1451_v0  ;;  %793 = vmatprep.subr.bf16.mxu1 %v1453_v1  ;;  %v833_v0 = vrot.slane %v1721_v61, %v815_v39  ;;  %v823_v1 = vadd.f32 %v822_v47, %v817_v49 }
  0x43   : > { %906 = vperm.xlu0 %1357, %v1723_v62  }
  0x44   : > { %1359 = vset.pattern.permute.xlu1 %v1491_v16  ;;  %v829_v14 = vadd.f32 %v828_v57, %v823_v1  ;;  %v1022_v16 = vmul.f32 %v1021_v42, %v1728_v63 }
  0x45   : > { %753 = vmatpush1.bf16.msra.mxu0 %v1455_v9  ;;  %794 = vmatpush1.bf16.msra.mxu1 %v1456_v10  ;;  %v892_v9 = vadd.f32 %v891_v52, %v886_v53  ;;  %v954_v10 = vmul.f32 %v953_v55, %v1728_v63 }
  0x46   : > { %1042 = vperm.xlu1 %1359, %v1723_v62  }
  0x47   : > { %1360 = vset.pattern.permute.xlu0 %v1486_v32  ;;  %v960_v59 = vadd.f32 %v959_v11, %v954_v10 }
  0x48   : > { %755 = vmatmul.mubr.bf16.vlgmr.msra.gmra.mrb[0].mxu0 %v1249_v13  ;;  %796 = vmatmul.mubr.bf16.vlgmr.msra.gmra.mrb[0].mxu1 %v1249_v13  ;;  %v834_v13 = vmul.f32 %v833_v0, %v1746_v5 }
  0x9b   : > { %v1005_v54 = vpop.permute.xlu1 %1004  ;;  %v869_v17 = vpop.permute.xlu0 %868 }
  0x9f   : > { %v874_v18 = vpop.permute.xlu1 %873 }
  0xa3   : > { %v937_v19 = vpop.permute.xlu0 %936 }
  0xa7   : > { %v1073_v20 = vpop.permute.xlu1 %1072  ;;  %v942_v21 = vpop.permute.xlu0 %941 }
  0xab   : > { %v1010_v36 = vpop.permute.xlu1 %1009 }
  0xb1   : > { %v1078_v35 = vpop.permute.xlu0 %1077 }
  0xba   : > { %v839_v2 = vpop.permute.xlu1 %838 }
 0x11b   : > { %v756_v22 = vpop.f32.mrb[0].mxu0  ;;  %v1837_v23 = vpop.f32.mrb[0].mxu1 }
 0x11c   : > { %v871_v24 = vadd.f32 %v869_v17, %v756_v22  ;;  %v1839_v25 = vpop.f32.mrb[1].mxu0  ;;  %v1841_v26 = vpop.f32.mrb[1].mxu1  ;;  %v1007_v31 = vadd.f32 %v1005_v54, %v1837_v23  ;;  %v1027_v54 = vmul.f32 %v1026_v8, %v1736_v3  ;;  %v898_v17 = vadd.f32 %v897_v6, %v892_v9 }
 0x11d   : > { %v939_v27 = vadd.f32 %v937_v19, %v1839_v25  ;;  %v760_v28 = vpop.f32.mrb[2].mxu0  ;;  %v1075_v29 = vadd.f32 %v1073_v20, %v1841_v26  ;;  %v801_v62 = vpop.f32.mrb[2].mxu1  ;;  %v970_v19 = vrot.slane %v1721_v61, %v952_v46 }
 0x11e   : > { %v876_v30 = vmul.f32 %v874_v18, %v871_v24  ;;  %v761_v32 = vpop.f32.mrb[3].mxu0  ;;  %v802_v33 = vpop.f32.mrb[3].mxu1  ;;  %v1012_v38 = vmul.f32 %v1010_v36, %v1007_v31  ;;  %v965_v18 = vmul.f32 %v964_v12, %v1741_v4  ;;  %v841_v24 = vadd.f32 %v839_v2, %v756_v22 }
 0x11f   : > { %v944_v34 = vmul.f32 %v942_v21, %v939_v27  ;;  %v1080_v37 = vmul.f32 %v1078_v35, %v1075_v29  ;;  %v907_v20 = vpop.permute.xlu0 %906  ;;  %v975_v21 = vpop.permute.xlu1 %974  ;;  %v835_v27 = vadd.f32 %v834_v13, %v829_v14  ;;  %v1028_v28 = vadd.f32 %v1027_v54, %v1022_v16 }
 0x120   : > { %878 = vrot.lane.b32.xlu0 %v876_v30, %s1487_s6  ;;  %v1033_v29 = vmul.f32 %v1032_v58, %v1741_v4  ;;  %v1038_v62 = vrot.slane %v1721_v61, %v1020_v51  ;;  %v904_v63 = vadd.f32 %v903_v15, %v898_v17  ;;  %v909_v3 = vadd.f32 %v907_v20, %v1839_v25 }
 0x121   : > { %946 = vrot.lane.b32.xlu1 %v944_v34, %s1487_s6  ;;  %v966_v30 = vadd.f32 %v965_v18, %v960_v59  ;;  %v971_v60 = vmul.f32 %v970_v19, %v1746_v5  ;;  %v842_v31 = vmul.f32 %v841_v24, %v835_v27 }
 0x122   : > { %v1034_v32 = vadd.f32 %v1033_v29, %v1028_v28  ;;  %v1039_v33 = vmul.f32 %v1038_v62, %v1746_v5  ;;  %v910_v36 = vmul.f32 %v909_v3, %v904_v63 }
 0x123   : > { %v1043_v34 = vpop.permute.xlu1 %1042  ;;  %v972_v22 = vadd.f32 %v971_v60, %v966_v30 }
 0x124   : > { %1014 = vrot.lane.b32.xlu0 %v1012_v38, %s1487_s6  ;;  %v1040_v40 = vadd.f32 %v1039_v33, %v1034_v32  ;;  %v1045_v25 = vadd.f32 %v1043_v34, %v1841_v26 }
 0x125   : > { %1082 = vrot.lane.b32.xlu1 %v1080_v37, %s1487_s6  ;;  %v977_v37 = vadd.f32 %v975_v21, %v1837_v23 }
 0x126   : > { %v1046_v45 = vmul.f32 %v1045_v25, %v1040_v40 }
 0x127   : > { %v978_v61 = vmul.f32 %v977_v37, %v972_v22 }
 0x192   : > { %v879_v35 = vpop.permute.xlu0 %878 }
 0x193   : > { %v881_v38 = vadd.f32 %v879_v35, %v842_v31  ;;  %v947_v39 = vpop.permute.xlu1 %946 }
 0x195   : > { %v911_v4 = vadd.f32 %v910_v36, %v881_v38 }
 0x196   : > { %v1015_v44 = vpop.permute.xlu0 %1014 }
 0x197   : > { %v949_v41 = vadd.f32 %v947_v39, %v911_v4  ;;  %v1083_v47 = vpop.permute.xlu1 %1082 }
 0x199   : > { %v979_v43 = vadd.f32 %v978_v61, %v949_v41 }
 0x19b   : > { %v1017_v46 = vadd.f32 %v1015_v44, %v979_v43 }
 0x19d   : > { %v1047_v5 = vadd.f32 %v1046_v45, %v1017_v46 }
 0x19f   : > { %v1085_v48 = vadd.f32 %v1083_v47, %v1047_v5 }
 0x1a1   : > { %v1087_v49 = vsel %vm1086_vm0, %v1085_v48, 0.0 }
 0x1a2   : > { %v1088_v50 = vrot.slane %v1087_v49, 4 }
 0x1a4   : > { %v1089_v23 = vadd.f32 %v1088_v50, %v1087_v49 }
 0x1a6   : > { %v1090_v51 = vrot.slane %v1089_v23, 2 }
 0x1a8   : > { %v1091_v52 = vadd.f32 %v1090_v51, %v1089_v23 }
 0x1aa   : > { %v1092_v53 = vrot.slane %v1091_v52, 1 }
 0x1ac   : > { %v1093_v55 = vadd.f32 %v1092_v53, %v1091_v52 }
 0x1ae   : > { %v1094_v56 = vsel %vm1086_vm0, %v1093_v55, 0.0 }
 0x1af   : > { %1095 = vadd.xlane.f32.xlu0 %v1094_v56 }
 0x23c   : > { %v1096_v26 = vpop.xlane.xlu0 %1095 }
 0x23d   : > { %1097 = vst [vmem:[%s329_s25] sm:$0xff] %v1096_v26 }
 0x23e PF: > { %s15_s20 = sadd.s32 1, %s1481_s20   ;;  %s1908_s18 = smov %s1477_s19 }
 0x23f   : > { %p12_p5 = scmp.ge.s32.totalorder %s15_s20, 4   ;;  %s1909_s19 = smov %s1911_s21 }
 0x241   :  { %14 = sbr.rel (!%p12_p5) target bundleno = 2 (0x2), region = 82 }

</bundles_post_ra>
